<compile_context>
chip_gen: v7x
topology: tpu7x:2x2x1
jax: 0.10.0
libtpu: 0.0.40
codegen_flags: <defaults>
</compile_context>

<pallas_src>
import math
import functools

import jax
import jax.numpy as jnp
from jax.experimental import pallas as pl
from jax.experimental.pallas import tpu as pltpu

EPS = 1e-6


# ---------------------------------------------------------------------------
# In-kernel LayerNorm, torch-module semantics:
#   mean, Bessel-corrected std, divide by (std + eps).
# Centered variance (x - mean is needed for the output anyway, so this is as
# cheap as the single-pass form but robust when |mean| >> std).
# ---------------------------------------------------------------------------
def _layernorm(x, gamma, beta, eps=EPS):
    # x: (T, D) f32, gamma/beta: (1, D) f32
    D = x.shape[-1]
    mean = jnp.sum(x, axis=-1, keepdims=True) * (1.0 / D)
    xc = x - mean
    var = jnp.sum(xc * xc, axis=-1, keepdims=True) * (1.0 / (D - 1))  # Bessel
    inv = pl.reciprocal(jnp.sqrt(var) + eps, approx=False)
    return gamma * xc * inv + beta


# ---------------------------------------------------------------------------
# Fused encoder-layer kernel.
# grid = (B, n_q_tiles, n_kv_tiles); kv axis is the trailing reduction axis.
# ---------------------------------------------------------------------------
def encoder_layer_kernel(xq_ref, xkv_ref,
                         g1_ref, be1_ref, wq_ref, bq_ref, wkv_ref, bkv_ref,
                         wo_ref, bo_ref, g2_ref, be2_ref,
                         w1_ref, b1_ref, w2_ref, b2_ref,
                         o_ref,
                         q_scr, kc_scr, vc_scr, m_scr, l_scr, acc_scr,
                         *, n_heads, scale):
    qi = pl.program_id(1)
    ki = pl.program_id(2)
    nk = pl.num_programs(2)

    tq = q_scr.shape[1]
    dk = q_scr.shape[2]
    D = n_heads * dk
    tk = xkv_ref.shape[1]

    # ---- K|V cache fill: once per (batch, kv-tile), only on the first
    # q-tile (qi == 0); later q-tiles reuse the cached projection. -----------
    @pl.when(qi == 0)
    def _fill_kv():
        xkv = xkv_ref[0].astype(jnp.float32)                       # (tk, D)
        xkvn = _layernorm(xkv, g1_ref[...], be1_ref[...])
        kv = jnp.dot(xkvn.astype(jnp.bfloat16), wkv_ref[...],
                     preferred_element_type=jnp.float32) + bkv_ref[...]
        kv = kv.astype(jnp.bfloat16)                               # (tk, 2D)
        row0 = pl.multiple_of(ki * tk, tk)
        for h in range(n_heads):                                   # static slices
            kc_scr[h, pl.ds(row0, tk), :] = kv[:, h * dk:(h + 1) * dk]
            vc_scr[h, pl.ds(row0, tk), :] = kv[:, D + h * dk:D + (h + 1) * dk]

    # ---- init: once per (batch, q-tile): LN1 + Q projection (scaled), reset
    # online-softmax state. ----------------------------------------------------
    @pl.when(ki == 0)
    def _init():
        xq = xq_ref[0].astype(jnp.float32)                         # (tq, D)
        xqn = _layernorm(xq, g1_ref[...], be1_ref[...])
        q = jnp.dot(xqn.astype(jnp.bfloat16), wq_ref[...],
                    preferred_element_type=jnp.float32) + bq_ref[...]
        q = (q * scale).astype(jnp.bfloat16)                       # fold 1/sqrt(dk)
        for h in range(n_heads):                                   # static slices
            q_scr[h] = q[:, h * dk:(h + 1) * dk]
        m_scr[...] = jnp.full_like(m_scr, -1e30)
        l_scr[...] = jnp.zeros_like(l_scr)
        acc_scr[...] = jnp.zeros_like(acc_scr)

    # ---- per kv-tile: online-softmax update, K/V read from the VMEM cache.
    # fori_loop bounds vreg liveness when n_heads is large. --------------------
    row0 = pl.multiple_of(ki * tk, tk)

    def head_body(h, carry):
        qh = q_scr[h]                                              # (tq, dk) bf16
        kh = kc_scr[h, pl.ds(row0, tk), :]                         # (tk, dk) bf16
        vh = vc_scr[h, pl.ds(row0, tk), :]                         # (tk, dk) bf16
        s = jax.lax.dot_general(qh, kh, (((1,), (1,)), ((), ())),
                                preferred_element_type=jnp.float32)  # (tq, tk)
        m_prev = m_scr[h]                                          # (tq, 1)
        m_new = jnp.maximum(m_prev, jnp.max(s, axis=-1, keepdims=True))
        # bf16 exponentials (EUP bf16 path on v6e/v7x); sums/accumulation in f32.
        alpha = jnp.exp((m_prev - m_new).astype(jnp.bfloat16)).astype(jnp.float32)
        p = jnp.exp((s - m_new).astype(jnp.bfloat16))              # (tq, tk) bf16
        l_scr[h] = alpha * l_scr[h] + jnp.sum(p.astype(jnp.float32),
                                              axis=-1, keepdims=True)
        acc_scr[h] = alpha * acc_scr[h] + jnp.dot(
            p, vh, preferred_element_type=jnp.float32)
        m_scr[h] = m_new
        return carry

    jax.lax.fori_loop(0, n_heads, head_body, 0,
                      unroll=n_heads if n_heads <= 4 else 2)

    # ---- finalize: normalize, ONE full-D Wo matmul + residual, then fused
    # LN2 + FFN + residual. -----------------------------------------------------
    @pl.when(ki == nk - 1)
    def _finalize():
        xq = xq_ref[0].astype(jnp.float32)                         # (tq, D)
        ctx = jnp.concatenate(
            [(acc_scr[h] * pl.reciprocal(l_scr[h], approx=True)
              ).astype(jnp.bfloat16) for h in range(n_heads)], axis=-1)  # (tq, D)
        attn = jnp.dot(ctx, wo_ref[...], preferred_element_type=jnp.float32)
        y = xq + attn + bo_ref[...]                                # sublayer 0 out

        yn = _layernorm(y, g2_ref[...], be2_ref[...])
        # TODO(synk): for d_ff too large for resident weights, stream w1/w2 in
        # DFF chunks (memory_space=pl.ANY + pltpu.emit_pipeline) and accumulate.
        hdd = jnp.dot(yn.astype(jnp.bfloat16), w1_ref[...],
                      preferred_element_type=jnp.float32) + b1_ref[...]
        hdd = jnp.maximum(hdd, 0.0)
        ff = jnp.dot(hdd.astype(jnp.bfloat16), w2_ref[...],
                     preferred_element_type=jnp.float32) + b2_ref[...]
        o_ref[0] = (y + ff).astype(o_ref.dtype)                    # sublayer 1 out


# ---------------------------------------------------------------------------
# Wrapper
# ---------------------------------------------------------------------------
def _pick_tile(n, preferred):
    for t in preferred:
        if t <= n and n % t == 0:
            return t
    return n


def _default_vmem_limit():
    # v5e / v5p / v6e have 128 MiB physical VMEM; v7x only 64 MiB.
    try:
        kind = jax.devices()[0].device_kind.lower()
    except Exception:
        return 48 * 1024 * 1024
    if any(tag in kind for tag in ("v5 lite", "v5e", "v5p", "v6")):
        return 100 * 1024 * 1024
    return 48 * 1024 * 1024


def encoder_layer_forward(x, params, n_heads, *, tq=None, tk=None,
                          vmem_limit_bytes=None):
    """EncoderLayer.forward(x, mask=None) -- fully fused, flash-tiled."""
    B, S, D = x.shape
    assert D % n_heads == 0
    dk = D // n_heads
    # Tile defaults: tq prefers 256 (feeds the 256-wide MXU on v6e/v7x),
    # tk prefers 512; both shrink automatically for short sequences.
    tq = tq if tq is not None else _pick_tile(S, (256, 128, 64, 32, 16, 8))
    tk = tk if tk is not None else _pick_tile(S, (512, 256, 128, 64, 32, 16, 8))
    nq, nk = S // tq, S // tk
    if vmem_limit_bytes is None:
        vmem_limit_bytes = _default_vmem_limit()

    (g1, be1, wq, bq, wkv, bkv, wo, bo, g2, be2, w1, b1, w2, b2) = params

    kern = functools.partial(encoder_layer_kernel,
                             n_heads=n_heads, scale=1.0 / math.sqrt(dk))

    # Weights / biases / LN params: same full-array block every grid step, so
    # they stay VMEM-resident (DMA skipped when the block index is unchanged).
    # TODO(synk): single-buffer these (pipeline_mode=pl.Buffered(1)) once
    # verified on the target jax version; halves resident weight VMEM.
    def const_spec(shape):
        return pl.BlockSpec(shape, lambda b, qi, ki: (0,) * len(shape))

    in_specs = [
        # query rows of x
        pl.BlockSpec((1, tq, D), lambda b, qi, ki: (b, qi, 0)),
        # key/value rows of x: only needed while filling the K|V cache
        # (qi == 0); afterwards pin block 0 so the unchanged block index
        # suppresses further HBM reads of x on the kv path.
        pl.BlockSpec((1, tk, D),
                     lambda b, qi, ki: (b, jnp.where(qi == 0, ki, 0), 0)),
    ] + [const_spec(p.shape) for p in params]

    # TODO(synk): for sequences where the bf16 K|V cache (2 * S * D bytes) no
    # longer fits the VMEM budget, precompute K|V to HBM in a small separate
    # pallas_call and stream those tiles instead of caching in VMEM.
    return pl.pallas_call(
        kern,
        out_shape=jax.ShapeDtypeStruct((B, S, D), x.dtype),
        grid=(B, nq, nk),
        in_specs=in_specs,
        out_specs=pl.BlockSpec((1, tq, D), lambda b, qi, ki: (b, qi, 0)),
        scratch_shapes=[
            pltpu.VMEM((n_heads, tq, dk), jnp.bfloat16),   # LN'd, scaled Q (head-major)
            pltpu.VMEM((n_heads, S, dk), jnp.bfloat16),    # projected K cache
            pltpu.VMEM((n_heads, S, dk), jnp.bfloat16),    # projected V cache
            pltpu.VMEM((n_heads, tq, 1), jnp.float32),     # running max
            pltpu.VMEM((n_heads, tq, 1), jnp.float32),     # running denom
            pltpu.VMEM((n_heads, tq, dk), jnp.float32),    # per-head ctx accumulator
        ],
        compiler_params=pltpu.CompilerParams(
            # qi must stay "arbitrary": the K|V cache is filled at qi == 0 and
            # reused by later q-tiles of the same batch (state carried across
            # qi).  Megacore parallelism (v7x) comes from the batch axis.
            dimension_semantics=("parallel", "arbitrary", "arbitrary"),
            vmem_limit_bytes=vmem_limit_bytes,
        ),
    )(x, x, *params)


# ---------------------------------------------------------------------------
# Parameters (weights stored bf16 for MXU / VMEM residency; biases & LN f32)
# ---------------------------------------------------------------------------
def init_params(key, d_model, d_ff):
    ks = jax.random.split(key, 6)
    scale = 0.02

    def lin(k, fi, fo):
        kw, kb = jax.random.split(k)
        w = (jax.random.normal(kw, (fi, fo), jnp.float32) * scale).astype(jnp.bfloat16)
        b = jax.random.normal(kb, (1, fo), jnp.float32) * scale
        return w, b

    wq, bq = lin(ks[0], d_model, d_model)
    wk, bk = lin(ks[1], d_model, d_model)
    wv, bv = lin(ks[2], d_model, d_model)
    wo, bo = lin(ks[3], d_model, d_model)
    w1, b1 = lin(ks[4], d_model, d_ff)
    w2, b2 = lin(ks[5], d_ff, d_model)

    # fuse K|V projections into one (D, 2D) matmul
    wkv = jnp.concatenate([wk, wv], axis=1)
    bkv = jnp.concatenate([bk, bv], axis=1)

    g1 = jnp.ones((1, d_model), jnp.float32)
    be1 = jnp.zeros((1, d_model), jnp.float32)
    g2 = jnp.ones((1, d_model), jnp.float32)
    be2 = jnp.zeros((1, d_model), jnp.float32)

    return (g1, be1, wq, bq, wkv, bkv, wo, bo, g2, be2, w1, b1, w2, b2)


# ---------------------------------------------------------------------------
# Pure-JAX f32 reference (same torch-style LN semantics) for a sanity check.
# ---------------------------------------------------------------------------
def _ln_ref(x, g, b, eps=EPS):
    mean = jnp.mean(x, axis=-1, keepdims=True)
    var = jnp.sum((x - mean) ** 2, axis=-1, keepdims=True) / (x.shape[-1] - 1)
    return g * (x - mean) / (jnp.sqrt(var) + eps) + b


def encoder_layer_reference(x, params, n_heads):
    (g1, be1, wq, bq, wkv, bkv, wo, bo, g2, be2, w1, b1, w2, b2) = [
        p.astype(jnp.float32) for p in params]
    B, S, D = x.shape
    dk = D // n_heads
    xn = _ln_ref(x, g1, be1)
    q = xn @ wq + bq
    kvp = xn @ wkv + bkv
    k, v = kvp[..., :D], kvp[..., D:]
    qh = q.reshape(B, S, n_heads, dk).transpose(0, 2, 1, 3)
    kh = k.reshape(B, S, n_heads, dk).transpose(0, 2, 1, 3)
    vh = v.reshape(B, S, n_heads, dk).transpose(0, 2, 1, 3)
    s = jnp.einsum('bhqd,bhkd->bhqk', qh, kh) / math.sqrt(dk)
    p_attn = jax.nn.softmax(s, axis=-1)
    ctx = jnp.einsum('bhqk,bhkd->bhqd', p_attn, vh)
    ctx = ctx.transpose(0, 2, 1, 3).reshape(B, S, D)
    y = x + ctx @ wo + bo
    yn = _ln_ref(y, g2, be2)
    ff = jnp.maximum(yn @ w1 + b1, 0.0) @ w2 + b2
    return y + ff


if __name__ == "__main__":
    B, S, D, H, DFF = 2, 8, 32, 4, 64
    key = jax.random.PRNGKey(0)
    kx, kp = jax.random.split(key)
    x = jax.random.normal(kx, (B, S, D), dtype=jnp.float32)
    params = init_params(kp, D, DFF)

    out = encoder_layer_forward(x, params, n_heads=H)
    out = jax.block_until_ready(out)

    assert out.shape == (B, S, D)
    assert bool(jnp.all(jnp.isfinite(out)))

    ref = encoder_layer_reference(x, params, n_heads=H)
    max_err = float(jnp.max(jnp.abs(out - ref)))
    # bf16 MXU inputs + bf16 exp + approx reciprocal => loose tolerance vs f32
    assert max_err < 2e-2, f"max abs error {max_err}"

    print("KERNEL_OK")
</pallas_src>

<mosaic_0001>
module attributes {stable_mosaic.version = 11 : i64} {
  func.func @encoder_layer_kernel(%arg0: i32, %arg1: i32, %arg2: i32, %arg3: memref<1x8x32xf32, #tpu.memory_space<vmem>>, %arg4: memref<1x8x32xf32, #tpu.memory_space<vmem>>, %arg5: memref<1x32xf32, #tpu.memory_space<vmem>>, %arg6: memref<1x32xf32, #tpu.memory_space<vmem>>, %arg7: memref<32x32xbf16, #tpu.memory_space<vmem>>, %arg8: memref<1x32xf32, #tpu.memory_space<vmem>>, %arg9: memref<32x64xbf16, #tpu.memory_space<vmem>>, %arg10: memref<1x64xf32, #tpu.memory_space<vmem>>, %arg11: memref<32x32xbf16, #tpu.memory_space<vmem>>, %arg12: memref<1x32xf32, #tpu.memory_space<vmem>>, %arg13: memref<1x32xf32, #tpu.memory_space<vmem>>, %arg14: memref<1x32xf32, #tpu.memory_space<vmem>>, %arg15: memref<32x64xbf16, #tpu.memory_space<vmem>>, %arg16: memref<1x64xf32, #tpu.memory_space<vmem>>, %arg17: memref<64x32xbf16, #tpu.memory_space<vmem>>, %arg18: memref<1x32xf32, #tpu.memory_space<vmem>>, %arg19: memref<1x8x32xf32, #tpu.memory_space<vmem>>, %arg20: memref<4x8x8xbf16, #tpu.memory_space<vmem>>, %arg21: memref<4x8x8xbf16, #tpu.memory_space<vmem>>, %arg22: memref<4x8x8xbf16, #tpu.memory_space<vmem>>, %arg23: memref<4x8x1xf32, #tpu.memory_space<vmem>>, %arg24: memref<4x8x1xf32, #tpu.memory_space<vmem>>, %arg25: memref<4x8x8xf32, #tpu.memory_space<vmem>>) attributes {dimension_semantics = [#tpu.dimension_semantics<parallel>, #tpu.dimension_semantics<arbitrary>, #tpu.dimension_semantics<arbitrary>], iteration_bounds = array<i64: 2, 1, 1>, scalar_prefetch = 0 : i64, scratch_operands = 6 : i64, tpu.core_type = #tpu.core_type<tc>, window_params = [{transform_indices = @transform_0, window_bounds = array<i64: 1, 8, 32>}, {transform_indices = @transform_1, window_bounds = array<i64: 1, 8, 32>}, {pipeline_mode = #tpu.pipeline_mode<synchronous>, transform_indices = @transform_2, window_bounds = array<i64: 1, 32>}, {pipeline_mode = #tpu.pipeline_mode<synchronous>, transform_indices = @transform_3, window_bounds = array<i64: 1, 32>}, {pipeline_mode = #tpu.pipeline_mode<synchronous>, transform_indices = @transform_4, window_bounds = array<i64: 32, 32>}, {pipeline_mode = #tpu.pipeline_mode<synchronous>, transform_indices = @transform_5, window_bounds = array<i64: 1, 32>}, {pipeline_mode = #tpu.pipeline_mode<synchronous>, transform_indices = @transform_6, window_bounds = array<i64: 32, 64>}, {pipeline_mode = #tpu.pipeline_mode<synchronous>, transform_indices = @transform_7, window_bounds = array<i64: 1, 64>}, {pipeline_mode = #tpu.pipeline_mode<synchronous>, transform_indices = @transform_8, window_bounds = array<i64: 32, 32>}, {pipeline_mode = #tpu.pipeline_mode<synchronous>, transform_indices = @transform_9, window_bounds = array<i64: 1, 32>}, {pipeline_mode = #tpu.pipeline_mode<synchronous>, transform_indices = @transform_10, window_bounds = array<i64: 1, 32>}, {pipeline_mode = #tpu.pipeline_mode<synchronous>, transform_indices = @transform_11, window_bounds = array<i64: 1, 32>}, {pipeline_mode = #tpu.pipeline_mode<synchronous>, transform_indices = @transform_12, window_bounds = array<i64: 32, 64>}, {pipeline_mode = #tpu.pipeline_mode<synchronous>, transform_indices = @transform_13, window_bounds = array<i64: 1, 64>}, {pipeline_mode = #tpu.pipeline_mode<synchronous>, transform_indices = @transform_14, window_bounds = array<i64: 64, 32>}, {pipeline_mode = #tpu.pipeline_mode<synchronous>, transform_indices = @transform_15, window_bounds = array<i64: 1, 32>}, {transform_indices = @transform_16, window_bounds = array<i64: 1, 8, 32>}]} {
    %c0_i32 = arith.constant 0 : i32
    %0 = arith.cmpi eq, %arg1, %c0_i32 : i32
    %1 = arith.extui %0 : i1 to i32
    %c0_i32_0 = arith.constant 0 : i32
    %2 = arith.cmpi ne, %1, %c0_i32_0 : i32
    scf.if %2 {
      %c0_84 = arith.constant 0 : index
      %c0_85 = arith.constant 0 : index
      %c0_86 = arith.constant 0 : index
      %223 = vector.load %arg4[%c0_84, %c0_85, %c0_86] : memref<1x8x32xf32, #tpu.memory_space<vmem>>, vector<1x8x32xf32>
      %224 = vector.shape_cast %223 : vector<1x8x32xf32> to vector<8x32xf32>
      %c0_87 = arith.constant 0 : index
      %c0_88 = arith.constant 0 : index
      %225 = vector.load %arg5[%c0_87, %c0_88] : memref<1x32xf32, #tpu.memory_space<vmem>>, vector<1x32xf32>
      %c0_89 = arith.constant 0 : index
      %c0_90 = arith.constant 0 : index
      %226 = vector.load %arg6[%c0_89, %c0_90] : memref<1x32xf32, #tpu.memory_space<vmem>>, vector<1x32xf32>
      %cst_91 = arith.constant dense<0.000000e+00> : vector<8xf32>
      %227 = vector.multi_reduction <add>, %224, %cst_91 [1] : vector<8x32xf32> to vector<8xf32>
      %228 = vector.shape_cast %227 : vector<8xf32> to vector<8x1xf32>
      %cst_92 = arith.constant 3.125000e-02 : f32
      %229 = vector.broadcast %cst_92 : f32 to vector<8x1xf32>
      %230 = arith.mulf %228, %229 : vector<8x1xf32>
      %231 = vector.broadcast %230 : vector<8x1xf32> to vector<8x32xf32>
      %232 = arith.subf %224, %231 : vector<8x32xf32>
      %233 = arith.mulf %232, %232 : vector<8x32xf32>
      %cst_93 = arith.constant dense<0.000000e+00> : vector<8xf32>
      %234 = vector.multi_reduction <add>, %233, %cst_93 [1] : vector<8x32xf32> to vector<8xf32>
      %235 = vector.shape_cast %234 : vector<8xf32> to vector<8x1xf32>
      %cst_94 = arith.constant 0.0322580636 : f32
      %236 = vector.broadcast %cst_94 : f32 to vector<8x1xf32>
      %237 = arith.mulf %235, %236 : vector<8x1xf32>
      %238 = math.sqrt %237 : vector<8x1xf32>
      %cst_95 = arith.constant 9.99999997E-7 : f32
      %239 = vector.broadcast %cst_95 : f32 to vector<8x1xf32>
      %240 = arith.addf %238, %239 : vector<8x1xf32>
      %241 = tpu.reciprocal %240 : vector<8x1xf32> -> vector<8x1xf32>
      %242 = vector.broadcast %225 : vector<1x32xf32> to vector<8x32xf32>
      %243 = arith.mulf %242, %232 : vector<8x32xf32>
      %244 = vector.broadcast %241 : vector<8x1xf32> to vector<8x32xf32>
      %245 = arith.mulf %243, %244 : vector<8x32xf32>
      %246 = vector.broadcast %226 : vector<1x32xf32> to vector<8x32xf32>
      %247 = arith.addf %245, %246 : vector<8x32xf32>
      %248 = arith.truncf %247 : vector<8x32xf32> to vector<8x32xbf16>
      %c0_96 = arith.constant 0 : index
      %c0_97 = arith.constant 0 : index
      %249 = vector.load %arg9[%c0_96, %c0_97] : memref<32x64xbf16, #tpu.memory_space<vmem>>, vector<32x64xbf16>
      %cst_98 = arith.constant dense<0.000000e+00> : vector<8x64xf32>
      %250 = tpu.matmul %248, %249, %cst_98 {dimension_numbers = #tpu.dot_dimension_numbers<[1], [0], [0], [1], [0, 0, 1, 1], [], []>} : vector<8x32xbf16>, vector<32x64xbf16>, vector<8x64xf32> -> vector<8x64xf32>
      %c0_99 = arith.constant 0 : index
      %c0_100 = arith.constant 0 : index
      %251 = vector.load %arg10[%c0_99, %c0_100] : memref<1x64xf32, #tpu.memory_space<vmem>>, vector<1x64xf32>
      %252 = vector.broadcast %251 : vector<1x64xf32> to vector<8x64xf32>
      %253 = arith.addf %250, %252 : vector<8x64xf32>
      %254 = arith.truncf %253 : vector<8x64xf32> to vector<8x64xbf16>
      %c8_i32_101 = arith.constant 8 : i32
      %255 = arith.muli %arg2, %c8_i32_101 : i32
      %256 = tpu.assume_multiple %255, 8 : i32
      %257 = vector.extract_strided_slice %254 {offsets = [0, 0], sizes = [8, 8], strides = [1, 1]} : vector<8x64xbf16> to vector<8x8xbf16>
      %c0_102 = arith.constant 0 : index
      %258 = arith.index_cast %256 : i32 to index
      %c0_103 = arith.constant 0 : index
      %259 = vector.load %arg21[%c0_102, %258, %c0_103] : memref<4x8x8xbf16, #tpu.memory_space<vmem>>, vector<1x8x8xbf16>
      %260 = vector.shape_cast %259 : vector<1x8x8xbf16> to vector<8x8xbf16>
      %261 = vector.shape_cast %257 : vector<8x8xbf16> to vector<1x8x8xbf16>
      tpu.vector_store %arg21[%c0_102, %258, %c0_103], %261 {strides = array<i32>} : memref<4x8x8xbf16, #tpu.memory_space<vmem>>, vector<1x8x8xbf16>,
      %262 = vector.extract_strided_slice %254 {offsets = [0, 32], sizes = [8, 8], strides = [1, 1]} : vector<8x64xbf16> to vector<8x8xbf16>
      %c0_104 = arith.constant 0 : index
      %263 = arith.index_cast %256 : i32 to index
      %c0_105 = arith.constant 0 : index
      %264 = vector.load %arg22[%c0_104, %263, %c0_105] : memref<4x8x8xbf16, #tpu.memory_space<vmem>>, vector<1x8x8xbf16>
      %265 = vector.shape_cast %264 : vector<1x8x8xbf16> to vector<8x8xbf16>
      %266 = vector.shape_cast %262 : vector<8x8xbf16> to vector<1x8x8xbf16>
      tpu.vector_store %arg22[%c0_104, %263, %c0_105], %266 {strides = array<i32>} : memref<4x8x8xbf16, #tpu.memory_space<vmem>>, vector<1x8x8xbf16>,
      %267 = vector.extract_strided_slice %254 {offsets = [0, 8], sizes = [8, 8], strides = [1, 1]} : vector<8x64xbf16> to vector<8x8xbf16>
      %c1 = arith.constant 1 : index
      %268 = arith.index_cast %256 : i32 to index
      %c0_106 = arith.constant 0 : index
      %269 = vector.load %arg21[%c1, %268, %c0_106] : memref<4x8x8xbf16, #tpu.memory_space<vmem>>, vector<1x8x8xbf16>
      %270 = vector.shape_cast %269 : vector<1x8x8xbf16> to vector<8x8xbf16>
      %271 = vector.shape_cast %267 : vector<8x8xbf16> to vector<1x8x8xbf16>
      tpu.vector_store %arg21[%c1, %268, %c0_106], %271 {strides = array<i32>} : memref<4x8x8xbf16, #tpu.memory_space<vmem>>, vector<1x8x8xbf16>,
      %272 = vector.extract_strided_slice %254 {offsets = [0, 40], sizes = [8, 8], strides = [1, 1]} : vector<8x64xbf16> to vector<8x8xbf16>
      %c1_107 = arith.constant 1 : index
      %273 = arith.index_cast %256 : i32 to index
      %c0_108 = arith.constant 0 : index
      %274 = vector.load %arg22[%c1_107, %273, %c0_108] : memref<4x8x8xbf16, #tpu.memory_space<vmem>>, vector<1x8x8xbf16>
      %275 = vector.shape_cast %274 : vector<1x8x8xbf16> to vector<8x8xbf16>
      %276 = vector.shape_cast %272 : vector<8x8xbf16> to vector<1x8x8xbf16>
      tpu.vector_store %arg22[%c1_107, %273, %c0_108], %276 {strides = array<i32>} : memref<4x8x8xbf16, #tpu.memory_space<vmem>>, vector<1x8x8xbf16>,
      %277 = vector.extract_strided_slice %254 {offsets = [0, 16], sizes = [8, 8], strides = [1, 1]} : vector<8x64xbf16> to vector<8x8xbf16>
      %c2 = arith.constant 2 : index
      %278 = arith.index_cast %256 : i32 to index
      %c0_109 = arith.constant 0 : index
      %279 = vector.load %arg21[%c2, %278, %c0_109] : memref<4x8x8xbf16, #tpu.memory_space<vmem>>, vector<1x8x8xbf16>
      %280 = vector.shape_cast %279 : vector<1x8x8xbf16> to vector<8x8xbf16>
      %281 = vector.shape_cast %277 : vector<8x8xbf16> to vector<1x8x8xbf16>
      tpu.vector_store %arg21[%c2, %278, %c0_109], %281 {strides = array<i32>} : memref<4x8x8xbf16, #tpu.memory_space<vmem>>, vector<1x8x8xbf16>,
      %282 = vector.extract_strided_slice %254 {offsets = [0, 48], sizes = [8, 8], strides = [1, 1]} : vector<8x64xbf16> to vector<8x8xbf16>
      %c2_110 = arith.constant 2 : index
      %283 = arith.index_cast %256 : i32 to index
      %c0_111 = arith.constant 0 : index
      %284 = vector.load %arg22[%c2_110, %283, %c0_111] : memref<4x8x8xbf16, #tpu.memory_space<vmem>>, vector<1x8x8xbf16>
      %285 = vector.shape_cast %284 : vector<1x8x8xbf16> to vector<8x8xbf16>
      %286 = vector.shape_cast %282 : vector<8x8xbf16> to vector<1x8x8xbf16>
      tpu.vector_store %arg22[%c2_110, %283, %c0_111], %286 {strides = array<i32>} : memref<4x8x8xbf16, #tpu.memory_space<vmem>>, vector<1x8x8xbf16>,
      %287 = vector.extract_strided_slice %254 {offsets = [0, 24], sizes = [8, 8], strides = [1, 1]} : vector<8x64xbf16> to vector<8x8xbf16>
      %c3 = arith.constant 3 : index
      %288 = arith.index_cast %256 : i32 to index
      %c0_112 = arith.constant 0 : index
      %289 = vector.load %arg21[%c3, %288, %c0_112] : memref<4x8x8xbf16, #tpu.memory_space<vmem>>, vector<1x8x8xbf16>
      %290 = vector.shape_cast %289 : vector<1x8x8xbf16> to vector<8x8xbf16>
      %291 = vector.shape_cast %287 : vector<8x8xbf16> to vector<1x8x8xbf16>
      tpu.vector_store %arg21[%c3, %288, %c0_112], %291 {strides = array<i32>} : memref<4x8x8xbf16, #tpu.memory_space<vmem>>, vector<1x8x8xbf16>,
      %292 = vector.extract_strided_slice %254 {offsets = [0, 56], sizes = [8, 8], strides = [1, 1]} : vector<8x64xbf16> to vector<8x8xbf16>
      %c3_113 = arith.constant 3 : index
      %293 = arith.index_cast %256 : i32 to index
      %c0_114 = arith.constant 0 : index
      %294 = vector.load %arg22[%c3_113, %293, %c0_114] : memref<4x8x8xbf16, #tpu.memory_space<vmem>>, vector<1x8x8xbf16>
      %295 = vector.shape_cast %294 : vector<1x8x8xbf16> to vector<8x8xbf16>
      %296 = vector.shape_cast %292 : vector<8x8xbf16> to vector<1x8x8xbf16>
      tpu.vector_store %arg22[%c3_113, %293, %c0_114], %296 {strides = array<i32>} : memref<4x8x8xbf16, #tpu.memory_space<vmem>>, vector<1x8x8xbf16>,
    } else {
    }
    %c0_i32_1 = arith.constant 0 : i32
    %3 = arith.cmpi eq, %arg2, %c0_i32_1 : i32
    %4 = arith.extui %3 : i1 to i32
    %c0_i32_2 = arith.constant 0 : i32
    %5 = arith.cmpi ne, %4, %c0_i32_2 : i32
    scf.if %5 {
      %c0_84 = arith.constant 0 : index
      %c0_85 = arith.constant 0 : index
      %c0_86 = arith.constant 0 : index
      %223 = vector.load %arg3[%c0_84, %c0_85, %c0_86] : memref<1x8x32xf32, #tpu.memory_space<vmem>>, vector<1x8x32xf32>
      %224 = vector.shape_cast %223 : vector<1x8x32xf32> to vector<8x32xf32>
      %c0_87 = arith.constant 0 : index
      %c0_88 = arith.constant 0 : index
      %225 = vector.load %arg5[%c0_87, %c0_88] : memref<1x32xf32, #tpu.memory_space<vmem>>, vector<1x32xf32>
      %c0_89 = arith.constant 0 : index
      %c0_90 = arith.constant 0 : index
      %226 = vector.load %arg6[%c0_89, %c0_90] : memref<1x32xf32, #tpu.memory_space<vmem>>, vector<1x32xf32>
      %cst_91 = arith.constant dense<0.000000e+00> : vector<8xf32>
      %227 = vector.multi_reduction <add>, %224, %cst_91 [1] : vector<8x32xf32> to vector<8xf32>
      %228 = vector.shape_cast %227 : vector<8xf32> to vector<8x1xf32>
      %cst_92 = arith.constant 3.125000e-02 : f32
      %229 = vector.broadcast %cst_92 : f32 to vector<8x1xf32>
      %230 = arith.mulf %228, %229 : vector<8x1xf32>
      %231 = vector.broadcast %230 : vector<8x1xf32> to vector<8x32xf32>
      %232 = arith.subf %224, %231 : vector<8x32xf32>
      %233 = arith.mulf %232, %232 : vector<8x32xf32>
      %cst_93 = arith.constant dense<0.000000e+00> : vector<8xf32>
      %234 = vector.multi_reduction <add>, %233, %cst_93 [1] : vector<8x32xf32> to vector<8xf32>
      %235 = vector.shape_cast %234 : vector<8xf32> to vector<8x1xf32>
      %cst_94 = arith.constant 0.0322580636 : f32
      %236 = vector.broadcast %cst_94 : f32 to vector<8x1xf32>
      %237 = arith.mulf %235, %236 : vector<8x1xf32>
      %238 = math.sqrt %237 : vector<8x1xf32>
      %cst_95 = arith.constant 9.99999997E-7 : f32
      %239 = vector.broadcast %cst_95 : f32 to vector<8x1xf32>
      %240 = arith.addf %238, %239 : vector<8x1xf32>
      %241 = tpu.reciprocal %240 : vector<8x1xf32> -> vector<8x1xf32>
      %242 = vector.broadcast %225 : vector<1x32xf32> to vector<8x32xf32>
      %243 = arith.mulf %242, %232 : vector<8x32xf32>
      %244 = vector.broadcast %241 : vector<8x1xf32> to vector<8x32xf32>
      %245 = arith.mulf %243, %244 : vector<8x32xf32>
      %246 = vector.broadcast %226 : vector<1x32xf32> to vector<8x32xf32>
      %247 = arith.addf %245, %246 : vector<8x32xf32>
      %248 = arith.truncf %247 : vector<8x32xf32> to vector<8x32xbf16>
      %c0_96 = arith.constant 0 : index
      %c0_97 = arith.constant 0 : index
      %249 = vector.load %arg7[%c0_96, %c0_97] : memref<32x32xbf16, #tpu.memory_space<vmem>>, vector<32x32xbf16>
      %cst_98 = arith.constant dense<0.000000e+00> : vector<8x32xf32>
      %250 = tpu.matmul %248, %249, %cst_98 {dimension_numbers = #tpu.dot_dimension_numbers<[1], [0], [0], [1], [0, 0, 1, 1], [], []>} : vector<8x32xbf16>, vector<32x32xbf16>, vector<8x32xf32> -> vector<8x32xf32>
      %c0_99 = arith.constant 0 : index
      %c0_100 = arith.constant 0 : index
      %251 = vector.load %arg8[%c0_99, %c0_100] : memref<1x32xf32, #tpu.memory_space<vmem>>, vector<1x32xf32>
      %252 = vector.broadcast %251 : vector<1x32xf32> to vector<8x32xf32>
      %253 = arith.addf %250, %252 : vector<8x32xf32>
      %cst_101 = arith.constant 0.353553385 : f32
      %254 = vector.broadcast %cst_101 : f32 to vector<8x32xf32>
      %255 = arith.mulf %253, %254 : vector<8x32xf32>
      %256 = arith.truncf %255 : vector<8x32xf32> to vector<8x32xbf16>
      %257 = vector.extract_strided_slice %256 {offsets = [0, 0], sizes = [8, 8], strides = [1, 1]} : vector<8x32xbf16> to vector<8x8xbf16>
      %c0_102 = arith.constant 0 : index
      %c0_103 = arith.constant 0 : index
      %c0_104 = arith.constant 0 : index
      %258 = vector.load %arg20[%c0_102, %c0_103, %c0_104] : memref<4x8x8xbf16, #tpu.memory_space<vmem>>, vector<1x8x8xbf16>
      %259 = vector.shape_cast %258 : vector<1x8x8xbf16> to vector<8x8xbf16>
      %260 = vector.shape_cast %257 : vector<8x8xbf16> to vector<1x8x8xbf16>
      tpu.vector_store %arg20[%c0_102, %c0_103, %c0_104], %260 {strides = array<i32>} : memref<4x8x8xbf16, #tpu.memory_space<vmem>>, vector<1x8x8xbf16>,
      %261 = vector.extract_strided_slice %256 {offsets = [0, 8], sizes = [8, 8], strides = [1, 1]} : vector<8x32xbf16> to vector<8x8xbf16>
      %c1 = arith.constant 1 : index
      %c0_105 = arith.constant 0 : index
      %c0_106 = arith.constant 0 : index
      %262 = vector.load %arg20[%c1, %c0_105, %c0_106] : memref<4x8x8xbf16, #tpu.memory_space<vmem>>, vector<1x8x8xbf16>
      %263 = vector.shape_cast %262 : vector<1x8x8xbf16> to vector<8x8xbf16>
      %264 = vector.shape_cast %261 : vector<8x8xbf16> to vector<1x8x8xbf16>
      tpu.vector_store %arg20[%c1, %c0_105, %c0_106], %264 {strides = array<i32>} : memref<4x8x8xbf16, #tpu.memory_space<vmem>>, vector<1x8x8xbf16>,
      %265 = vector.extract_strided_slice %256 {offsets = [0, 16], sizes = [8, 8], strides = [1, 1]} : vector<8x32xbf16> to vector<8x8xbf16>
      %c2 = arith.constant 2 : index
      %c0_107 = arith.constant 0 : index
      %c0_108 = arith.constant 0 : index
      %266 = vector.load %arg20[%c2, %c0_107, %c0_108] : memref<4x8x8xbf16, #tpu.memory_space<vmem>>, vector<1x8x8xbf16>
      %267 = vector.shape_cast %266 : vector<1x8x8xbf16> to vector<8x8xbf16>
      %268 = vector.shape_cast %265 : vector<8x8xbf16> to vector<1x8x8xbf16>
      tpu.vector_store %arg20[%c2, %c0_107, %c0_108], %268 {strides = array<i32>} : memref<4x8x8xbf16, #tpu.memory_space<vmem>>, vector<1x8x8xbf16>,
      %269 = vector.extract_strided_slice %256 {offsets = [0, 24], sizes = [8, 8], strides = [1, 1]} : vector<8x32xbf16> to vector<8x8xbf16>
      %c3 = arith.constant 3 : index
      %c0_109 = arith.constant 0 : index
      %c0_110 = arith.constant 0 : index
      %270 = vector.load %arg20[%c3, %c0_109, %c0_110] : memref<4x8x8xbf16, #tpu.memory_space<vmem>>, vector<1x8x8xbf16>
      %271 = vector.shape_cast %270 : vector<1x8x8xbf16> to vector<8x8xbf16>
      %272 = vector.shape_cast %269 : vector<8x8xbf16> to vector<1x8x8xbf16>
      tpu.vector_store %arg20[%c3, %c0_109, %c0_110], %272 {strides = array<i32>} : memref<4x8x8xbf16, #tpu.memory_space<vmem>>, vector<1x8x8xbf16>,
      %cst_111 = arith.constant -1.000000e+30 : f32
      %273 = vector.broadcast %cst_111 : f32 to vector<4x8x1xf32>
      %c0_112 = arith.constant 0 : index
      %c0_113 = arith.constant 0 : index
      %c0_114 = arith.constant 0 : index
      %274 = vector.load %arg23[%c0_112, %c0_113, %c0_114] : memref<4x8x1xf32, #tpu.memory_space<vmem>>, vector<4x8x1xf32>
      tpu.vector_store %arg23[%c0_112, %c0_113, %c0_114], %273 {strides = array<i32>} : memref<4x8x1xf32, #tpu.memory_space<vmem>>, vector<4x8x1xf32>,
      %cst_115 = arith.constant 0.000000e+00 : f32
      %275 = vector.broadcast %cst_115 : f32 to vector<4x8x1xf32>
      %c0_116 = arith.constant 0 : index
      %c0_117 = arith.constant 0 : index
      %c0_118 = arith.constant 0 : index
      %276 = vector.load %arg24[%c0_116, %c0_117, %c0_118] : memref<4x8x1xf32, #tpu.memory_space<vmem>>, vector<4x8x1xf32>
      tpu.vector_store %arg24[%c0_116, %c0_117, %c0_118], %275 {strides = array<i32>} : memref<4x8x1xf32, #tpu.memory_space<vmem>>, vector<4x8x1xf32>,
      %cst_119 = arith.constant 0.000000e+00 : f32
      %277 = vector.broadcast %cst_119 : f32 to vector<4x8x8xf32>
      %c0_120 = arith.constant 0 : index
      %c0_121 = arith.constant 0 : index
      %c0_122 = arith.constant 0 : index
      %278 = vector.load %arg25[%c0_120, %c0_121, %c0_122] : memref<4x8x8xf32, #tpu.memory_space<vmem>>, vector<4x8x8xf32>
      tpu.vector_store %arg25[%c0_120, %c0_121, %c0_122], %277 {strides = array<i32>} : memref<4x8x8xf32, #tpu.memory_space<vmem>>, vector<4x8x8xf32>,
    } else {
    }
    %c8_i32 = arith.constant 8 : i32
    %6 = arith.muli %arg2, %c8_i32 : i32
    %7 = tpu.assume_multiple %6, 8 : i32
    %c0_i32_3 = arith.constant 0 : i32
    %8 = arith.index_cast %c0_i32_3 : i32 to index
    %c0 = arith.constant 0 : index
    %c0_4 = arith.constant 0 : index
    %9 = vector.load %arg20[%8, %c0, %c0_4] : memref<4x8x8xbf16, #tpu.memory_space<vmem>>, vector<1x8x8xbf16>
    %10 = vector.shape_cast %9 : vector<1x8x8xbf16> to vector<8x8xbf16>
    %11 = arith.index_cast %c0_i32_3 : i32 to index
    %12 = arith.index_cast %7 : i32 to index
    %c0_5 = arith.constant 0 : index
    %13 = vector.load %arg21[%11, %12, %c0_5] : memref<4x8x8xbf16, #tpu.memory_space<vmem>>, vector<1x8x8xbf16>
    %14 = vector.shape_cast %13 : vector<1x8x8xbf16> to vector<8x8xbf16>
    %15 = arith.index_cast %c0_i32_3 : i32 to index
    %16 = arith.index_cast %7 : i32 to index
    %c0_6 = arith.constant 0 : index
    %17 = vector.load %arg22[%15, %16, %c0_6] : memref<4x8x8xbf16, #tpu.memory_space<vmem>>, vector<1x8x8xbf16>
    %18 = vector.shape_cast %17 : vector<1x8x8xbf16> to vector<8x8xbf16>
    %cst = arith.constant dense<0.000000e+00> : vector<8x8xf32>
    %19 = tpu.matmul %10, %14, %cst {dimension_numbers = #tpu.dot_dimension_numbers<[1], [1], [0], [0], [0, 0, 1, 0], [], []>} : vector<8x8xbf16>, vector<8x8xbf16>, vector<8x8xf32> -> vector<8x8xf32>
    %20 = arith.index_cast %c0_i32_3 : i32 to index
    %c0_7 = arith.constant 0 : index
    %c0_8 = arith.constant 0 : index
    %21 = vector.load %arg23[%20, %c0_7, %c0_8] : memref<4x8x1xf32, #tpu.memory_space<vmem>>, vector<1x8x1xf32>
    %22 = vector.shape_cast %21 : vector<1x8x1xf32> to vector<8x1xf32>
    %cst_9 = arith.constant dense<0xFF800000> : vector<8xf32>
    %23 = vector.multi_reduction <maximumf>, %19, %cst_9 [1] : vector<8x8xf32> to vector<8xf32>
    %24 = vector.shape_cast %23 : vector<8xf32> to vector<8x1xf32>
    %25 = arith.maximumf %22, %24 : vector<8x1xf32>
    %26 = arith.subf %22, %25 : vector<8x1xf32>
    %27 = arith.truncf %26 : vector<8x1xf32> to vector<8x1xbf16>
    %28 = math.exp %27 : vector<8x1xbf16>
    %29 = arith.extf %28 : vector<8x1xbf16> to vector<8x1xf32>
    %30 = vector.broadcast %25 : vector<8x1xf32> to vector<8x8xf32>
    %31 = arith.subf %19, %30 : vector<8x8xf32>
    %32 = arith.truncf %31 : vector<8x8xf32> to vector<8x8xbf16>
    %33 = math.exp %32 : vector<8x8xbf16>
    %34 = arith.index_cast %c0_i32_3 : i32 to index
    %c0_10 = arith.constant 0 : index
    %c0_11 = arith.constant 0 : index
    %35 = vector.load %arg24[%34, %c0_10, %c0_11] : memref<4x8x1xf32, #tpu.memory_space<vmem>>, vector<1x8x1xf32>
    %36 = vector.shape_cast %35 : vector<1x8x1xf32> to vector<8x1xf32>
    %37 = arith.mulf %29, %36 : vector<8x1xf32>
    %38 = arith.extf %33 : vector<8x8xbf16> to vector<8x8xf32>
    %cst_12 = arith.constant dense<0.000000e+00> : vector<8xf32>
    %39 = vector.multi_reduction <add>, %38, %cst_12 [1] : vector<8x8xf32> to vector<8xf32>
    %40 = vector.shape_cast %39 : vector<8xf32> to vector<8x1xf32>
    %41 = arith.addf %37, %40 : vector<8x1xf32>
    %42 = arith.index_cast %c0_i32_3 : i32 to index
    %c0_13 = arith.constant 0 : index
    %c0_14 = arith.constant 0 : index
    %43 = vector.load %arg24[%42, %c0_13, %c0_14] : memref<4x8x1xf32, #tpu.memory_space<vmem>>, vector<1x8x1xf32>
    %44 = vector.shape_cast %43 : vector<1x8x1xf32> to vector<8x1xf32>
    %45 = vector.shape_cast %41 : vector<8x1xf32> to vector<1x8x1xf32>
    tpu.vector_store %arg24[%42, %c0_13, %c0_14], %45 {strides = array<i32>} : memref<4x8x1xf32, #tpu.memory_space<vmem>>, vector<1x8x1xf32>,
    %46 = arith.index_cast %c0_i32_3 : i32 to index
    %c0_15 = arith.constant 0 : index
    %c0_16 = arith.constant 0 : index
    %47 = vector.load %arg25[%46, %c0_15, %c0_16] : memref<4x8x8xf32, #tpu.memory_space<vmem>>, vector<1x8x8xf32>
    %48 = vector.shape_cast %47 : vector<1x8x8xf32> to vector<8x8xf32>
    %49 = vector.broadcast %29 : vector<8x1xf32> to vector<8x8xf32>
    %50 = arith.mulf %49, %48 : vector<8x8xf32>
    %cst_17 = arith.constant dense<0.000000e+00> : vector<8x8xf32>
    %51 = tpu.matmul %33, %18, %cst_17 {dimension_numbers = #tpu.dot_dimension_numbers<[1], [0], [0], [1], [0, 0, 1, 1], [], []>} : vector<8x8xbf16>, vector<8x8xbf16>, vector<8x8xf32> -> vector<8x8xf32>
    %52 = arith.addf %50, %51 : vector<8x8xf32>
    %53 = arith.index_cast %c0_i32_3 : i32 to index
    %c0_18 = arith.constant 0 : index
    %c0_19 = arith.constant 0 : index
    %54 = vector.load %arg25[%53, %c0_18, %c0_19] : memref<4x8x8xf32, #tpu.memory_space<vmem>>, vector<1x8x8xf32>
    %55 = vector.shape_cast %54 : vector<1x8x8xf32> to vector<8x8xf32>
    %56 = vector.shape_cast %52 : vector<8x8xf32> to vector<1x8x8xf32>
    tpu.vector_store %arg25[%53, %c0_18, %c0_19], %56 {strides = array<i32>} : memref<4x8x8xf32, #tpu.memory_space<vmem>>, vector<1x8x8xf32>,
    %57 = arith.index_cast %c0_i32_3 : i32 to index
    %c0_20 = arith.constant 0 : index
    %c0_21 = arith.constant 0 : index
    %58 = vector.load %arg23[%57, %c0_20, %c0_21] : memref<4x8x1xf32, #tpu.memory_space<vmem>>, vector<1x8x1xf32>
    %59 = vector.shape_cast %58 : vector<1x8x1xf32> to vector<8x1xf32>
    %60 = vector.shape_cast %25 : vector<8x1xf32> to vector<1x8x1xf32>
    tpu.vector_store %arg23[%57, %c0_20, %c0_21], %60 {strides = array<i32>} : memref<4x8x1xf32, #tpu.memory_space<vmem>>, vector<1x8x1xf32>,
    %c1_i32 = arith.constant 1 : i32
    %61 = arith.index_cast %c1_i32 : i32 to index
    %c0_22 = arith.constant 0 : index
    %c0_23 = arith.constant 0 : index
    %62 = vector.load %arg20[%61, %c0_22, %c0_23] : memref<4x8x8xbf16, #tpu.memory_space<vmem>>, vector<1x8x8xbf16>
    %63 = vector.shape_cast %62 : vector<1x8x8xbf16> to vector<8x8xbf16>
    %64 = arith.index_cast %c1_i32 : i32 to index
    %65 = arith.index_cast %7 : i32 to index
    %c0_24 = arith.constant 0 : index
    %66 = vector.load %arg21[%64, %65, %c0_24] : memref<4x8x8xbf16, #tpu.memory_space<vmem>>, vector<1x8x8xbf16>
    %67 = vector.shape_cast %66 : vector<1x8x8xbf16> to vector<8x8xbf16>
    %68 = arith.index_cast %c1_i32 : i32 to index
    %69 = arith.index_cast %7 : i32 to index
    %c0_25 = arith.constant 0 : index
    %70 = vector.load %arg22[%68, %69, %c0_25] : memref<4x8x8xbf16, #tpu.memory_space<vmem>>, vector<1x8x8xbf16>
    %71 = vector.shape_cast %70 : vector<1x8x8xbf16> to vector<8x8xbf16>
    %cst_26 = arith.constant dense<0.000000e+00> : vector<8x8xf32>
    %72 = tpu.matmul %63, %67, %cst_26 {dimension_numbers = #tpu.dot_dimension_numbers<[1], [1], [0], [0], [0, 0, 1, 0], [], []>} : vector<8x8xbf16>, vector<8x8xbf16>, vector<8x8xf32> -> vector<8x8xf32>
    %73 = arith.index_cast %c1_i32 : i32 to index
    %c0_27 = arith.constant 0 : index
    %c0_28 = arith.constant 0 : index
    %74 = vector.load %arg23[%73, %c0_27, %c0_28] : memref<4x8x1xf32, #tpu.memory_space<vmem>>, vector<1x8x1xf32>
    %75 = vector.shape_cast %74 : vector<1x8x1xf32> to vector<8x1xf32>
    %cst_29 = arith.constant dense<0xFF800000> : vector<8xf32>
    %76 = vector.multi_reduction <maximumf>, %72, %cst_29 [1] : vector<8x8xf32> to vector<8xf32>
    %77 = vector.shape_cast %76 : vector<8xf32> to vector<8x1xf32>
    %78 = arith.maximumf %75, %77 : vector<8x1xf32>
    %79 = arith.subf %75, %78 : vector<8x1xf32>
    %80 = arith.truncf %79 : vector<8x1xf32> to vector<8x1xbf16>
    %81 = math.exp %80 : vector<8x1xbf16>
    %82 = arith.extf %81 : vector<8x1xbf16> to vector<8x1xf32>
    %83 = vector.broadcast %78 : vector<8x1xf32> to vector<8x8xf32>
    %84 = arith.subf %72, %83 : vector<8x8xf32>
    %85 = arith.truncf %84 : vector<8x8xf32> to vector<8x8xbf16>
    %86 = math.exp %85 : vector<8x8xbf16>
    %87 = arith.index_cast %c1_i32 : i32 to index
    %c0_30 = arith.constant 0 : index
    %c0_31 = arith.constant 0 : index
    %88 = vector.load %arg24[%87, %c0_30, %c0_31] : memref<4x8x1xf32, #tpu.memory_space<vmem>>, vector<1x8x1xf32>
    %89 = vector.shape_cast %88 : vector<1x8x1xf32> to vector<8x1xf32>
    %90 = arith.mulf %82, %89 : vector<8x1xf32>
    %91 = arith.extf %86 : vector<8x8xbf16> to vector<8x8xf32>
    %cst_32 = arith.constant dense<0.000000e+00> : vector<8xf32>
    %92 = vector.multi_reduction <add>, %91, %cst_32 [1] : vector<8x8xf32> to vector<8xf32>
    %93 = vector.shape_cast %92 : vector<8xf32> to vector<8x1xf32>
    %94 = arith.addf %90, %93 : vector<8x1xf32>
    %95 = arith.index_cast %c1_i32 : i32 to index
    %c0_33 = arith.constant 0 : index
    %c0_34 = arith.constant 0 : index
    %96 = vector.load %arg24[%95, %c0_33, %c0_34] : memref<4x8x1xf32, #tpu.memory_space<vmem>>, vector<1x8x1xf32>
    %97 = vector.shape_cast %96 : vector<1x8x1xf32> to vector<8x1xf32>
    %98 = vector.shape_cast %94 : vector<8x1xf32> to vector<1x8x1xf32>
    tpu.vector_store %arg24[%95, %c0_33, %c0_34], %98 {strides = array<i32>} : memref<4x8x1xf32, #tpu.memory_space<vmem>>, vector<1x8x1xf32>,
    %99 = arith.index_cast %c1_i32 : i32 to index
    %c0_35 = arith.constant 0 : index
    %c0_36 = arith.constant 0 : index
    %100 = vector.load %arg25[%99, %c0_35, %c0_36] : memref<4x8x8xf32, #tpu.memory_space<vmem>>, vector<1x8x8xf32>
    %101 = vector.shape_cast %100 : vector<1x8x8xf32> to vector<8x8xf32>
    %102 = vector.broadcast %82 : vector<8x1xf32> to vector<8x8xf32>
    %103 = arith.mulf %102, %101 : vector<8x8xf32>
    %cst_37 = arith.constant dense<0.000000e+00> : vector<8x8xf32>
    %104 = tpu.matmul %86, %71, %cst_37 {dimension_numbers = #tpu.dot_dimension_numbers<[1], [0], [0], [1], [0, 0, 1, 1], [], []>} : vector<8x8xbf16>, vector<8x8xbf16>, vector<8x8xf32> -> vector<8x8xf32>
    %105 = arith.addf %103, %104 : vector<8x8xf32>
    %106 = arith.index_cast %c1_i32 : i32 to index
    %c0_38 = arith.constant 0 : index
    %c0_39 = arith.constant 0 : index
    %107 = vector.load %arg25[%106, %c0_38, %c0_39] : memref<4x8x8xf32, #tpu.memory_space<vmem>>, vector<1x8x8xf32>
    %108 = vector.shape_cast %107 : vector<1x8x8xf32> to vector<8x8xf32>
    %109 = vector.shape_cast %105 : vector<8x8xf32> to vector<1x8x8xf32>
    tpu.vector_store %arg25[%106, %c0_38, %c0_39], %109 {strides = array<i32>} : memref<4x8x8xf32, #tpu.memory_space<vmem>>, vector<1x8x8xf32>,
    %110 = arith.index_cast %c1_i32 : i32 to index
    %c0_40 = arith.constant 0 : index
    %c0_41 = arith.constant 0 : index
    %111 = vector.load %arg23[%110, %c0_40, %c0_41] : memref<4x8x1xf32, #tpu.memory_space<vmem>>, vector<1x8x1xf32>
    %112 = vector.shape_cast %111 : vector<1x8x1xf32> to vector<8x1xf32>
    %113 = vector.shape_cast %78 : vector<8x1xf32> to vector<1x8x1xf32>
    tpu.vector_store %arg23[%110, %c0_40, %c0_41], %113 {strides = array<i32>} : memref<4x8x1xf32, #tpu.memory_space<vmem>>, vector<1x8x1xf32>,
    %c2_i32 = arith.constant 2 : i32
    %114 = arith.index_cast %c2_i32 : i32 to index
    %c0_42 = arith.constant 0 : index
    %c0_43 = arith.constant 0 : index
    %115 = vector.load %arg20[%114, %c0_42, %c0_43] : memref<4x8x8xbf16, #tpu.memory_space<vmem>>, vector<1x8x8xbf16>
    %116 = vector.shape_cast %115 : vector<1x8x8xbf16> to vector<8x8xbf16>
    %117 = arith.index_cast %c2_i32 : i32 to index
    %118 = arith.index_cast %7 : i32 to index
    %c0_44 = arith.constant 0 : index
    %119 = vector.load %arg21[%117, %118, %c0_44] : memref<4x8x8xbf16, #tpu.memory_space<vmem>>, vector<1x8x8xbf16>
    %120 = vector.shape_cast %119 : vector<1x8x8xbf16> to vector<8x8xbf16>
    %121 = arith.index_cast %c2_i32 : i32 to index
    %122 = arith.index_cast %7 : i32 to index
    %c0_45 = arith.constant 0 : index
    %123 = vector.load %arg22[%121, %122, %c0_45] : memref<4x8x8xbf16, #tpu.memory_space<vmem>>, vector<1x8x8xbf16>
    %124 = vector.shape_cast %123 : vector<1x8x8xbf16> to vector<8x8xbf16>
    %cst_46 = arith.constant dense<0.000000e+00> : vector<8x8xf32>
    %125 = tpu.matmul %116, %120, %cst_46 {dimension_numbers = #tpu.dot_dimension_numbers<[1], [1], [0], [0], [0, 0, 1, 0], [], []>} : vector<8x8xbf16>, vector<8x8xbf16>, vector<8x8xf32> -> vector<8x8xf32>
    %126 = arith.index_cast %c2_i32 : i32 to index
    %c0_47 = arith.constant 0 : index
    %c0_48 = arith.constant 0 : index
    %127 = vector.load %arg23[%126, %c0_47, %c0_48] : memref<4x8x1xf32, #tpu.memory_space<vmem>>, vector<1x8x1xf32>
    %128 = vector.shape_cast %127 : vector<1x8x1xf32> to vector<8x1xf32>
    %cst_49 = arith.constant dense<0xFF800000> : vector<8xf32>
    %129 = vector.multi_reduction <maximumf>, %125, %cst_49 [1] : vector<8x8xf32> to vector<8xf32>
    %130 = vector.shape_cast %129 : vector<8xf32> to vector<8x1xf32>
    %131 = arith.maximumf %128, %130 : vector<8x1xf32>
    %132 = arith.subf %128, %131 : vector<8x1xf32>
    %133 = arith.truncf %132 : vector<8x1xf32> to vector<8x1xbf16>
    %134 = math.exp %133 : vector<8x1xbf16>
    %135 = arith.extf %134 : vector<8x1xbf16> to vector<8x1xf32>
    %136 = vector.broadcast %131 : vector<8x1xf32> to vector<8x8xf32>
    %137 = arith.subf %125, %136 : vector<8x8xf32>
    %138 = arith.truncf %137 : vector<8x8xf32> to vector<8x8xbf16>
    %139 = math.exp %138 : vector<8x8xbf16>
    %140 = arith.index_cast %c2_i32 : i32 to index
    %c0_50 = arith.constant 0 : index
    %c0_51 = arith.constant 0 : index
    %141 = vector.load %arg24[%140, %c0_50, %c0_51] : memref<4x8x1xf32, #tpu.memory_space<vmem>>, vector<1x8x1xf32>
    %142 = vector.shape_cast %141 : vector<1x8x1xf32> to vector<8x1xf32>
    %143 = arith.mulf %135, %142 : vector<8x1xf32>
    %144 = arith.extf %139 : vector<8x8xbf16> to vector<8x8xf32>
    %cst_52 = arith.constant dense<0.000000e+00> : vector<8xf32>
    %145 = vector.multi_reduction <add>, %144, %cst_52 [1] : vector<8x8xf32> to vector<8xf32>
    %146 = vector.shape_cast %145 : vector<8xf32> to vector<8x1xf32>
    %147 = arith.addf %143, %146 : vector<8x1xf32>
    %148 = arith.index_cast %c2_i32 : i32 to index
    %c0_53 = arith.constant 0 : index
    %c0_54 = arith.constant 0 : index
    %149 = vector.load %arg24[%148, %c0_53, %c0_54] : memref<4x8x1xf32, #tpu.memory_space<vmem>>, vector<1x8x1xf32>
    %150 = vector.shape_cast %149 : vector<1x8x1xf32> to vector<8x1xf32>
    %151 = vector.shape_cast %147 : vector<8x1xf32> to vector<1x8x1xf32>
    tpu.vector_store %arg24[%148, %c0_53, %c0_54], %151 {strides = array<i32>} : memref<4x8x1xf32, #tpu.memory_space<vmem>>, vector<1x8x1xf32>,
    %152 = arith.index_cast %c2_i32 : i32 to index
    %c0_55 = arith.constant 0 : index
    %c0_56 = arith.constant 0 : index
    %153 = vector.load %arg25[%152, %c0_55, %c0_56] : memref<4x8x8xf32, #tpu.memory_space<vmem>>, vector<1x8x8xf32>
    %154 = vector.shape_cast %153 : vector<1x8x8xf32> to vector<8x8xf32>
    %155 = vector.broadcast %135 : vector<8x1xf32> to vector<8x8xf32>
    %156 = arith.mulf %155, %154 : vector<8x8xf32>
    %cst_57 = arith.constant dense<0.000000e+00> : vector<8x8xf32>
    %157 = tpu.matmul %139, %124, %cst_57 {dimension_numbers = #tpu.dot_dimension_numbers<[1], [0], [0], [1], [0, 0, 1, 1], [], []>} : vector<8x8xbf16>, vector<8x8xbf16>, vector<8x8xf32> -> vector<8x8xf32>
    %158 = arith.addf %156, %157 : vector<8x8xf32>
    %159 = arith.index_cast %c2_i32 : i32 to index
    %c0_58 = arith.constant 0 : index
    %c0_59 = arith.constant 0 : index
    %160 = vector.load %arg25[%159, %c0_58, %c0_59] : memref<4x8x8xf32, #tpu.memory_space<vmem>>, vector<1x8x8xf32>
    %161 = vector.shape_cast %160 : vector<1x8x8xf32> to vector<8x8xf32>
    %162 = vector.shape_cast %158 : vector<8x8xf32> to vector<1x8x8xf32>
    tpu.vector_store %arg25[%159, %c0_58, %c0_59], %162 {strides = array<i32>} : memref<4x8x8xf32, #tpu.memory_space<vmem>>, vector<1x8x8xf32>,
    %163 = arith.index_cast %c2_i32 : i32 to index
    %c0_60 = arith.constant 0 : index
    %c0_61 = arith.constant 0 : index
    %164 = vector.load %arg23[%163, %c0_60, %c0_61] : memref<4x8x1xf32, #tpu.memory_space<vmem>>, vector<1x8x1xf32>
    %165 = vector.shape_cast %164 : vector<1x8x1xf32> to vector<8x1xf32>
    %166 = vector.shape_cast %131 : vector<8x1xf32> to vector<1x8x1xf32>
    tpu.vector_store %arg23[%163, %c0_60, %c0_61], %166 {strides = array<i32>} : memref<4x8x1xf32, #tpu.memory_space<vmem>>, vector<1x8x1xf32>,
    %c3_i32 = arith.constant 3 : i32
    %167 = arith.index_cast %c3_i32 : i32 to index
    %c0_62 = arith.constant 0 : index
    %c0_63 = arith.constant 0 : index
    %168 = vector.load %arg20[%167, %c0_62, %c0_63] : memref<4x8x8xbf16, #tpu.memory_space<vmem>>, vector<1x8x8xbf16>
    %169 = vector.shape_cast %168 : vector<1x8x8xbf16> to vector<8x8xbf16>
    %170 = arith.index_cast %c3_i32 : i32 to index
    %171 = arith.index_cast %7 : i32 to index
    %c0_64 = arith.constant 0 : index
    %172 = vector.load %arg21[%170, %171, %c0_64] : memref<4x8x8xbf16, #tpu.memory_space<vmem>>, vector<1x8x8xbf16>
    %173 = vector.shape_cast %172 : vector<1x8x8xbf16> to vector<8x8xbf16>
    %174 = arith.index_cast %c3_i32 : i32 to index
    %175 = arith.index_cast %7 : i32 to index
    %c0_65 = arith.constant 0 : index
    %176 = vector.load %arg22[%174, %175, %c0_65] : memref<4x8x8xbf16, #tpu.memory_space<vmem>>, vector<1x8x8xbf16>
    %177 = vector.shape_cast %176 : vector<1x8x8xbf16> to vector<8x8xbf16>
    %cst_66 = arith.constant dense<0.000000e+00> : vector<8x8xf32>
    %178 = tpu.matmul %169, %173, %cst_66 {dimension_numbers = #tpu.dot_dimension_numbers<[1], [1], [0], [0], [0, 0, 1, 0], [], []>} : vector<8x8xbf16>, vector<8x8xbf16>, vector<8x8xf32> -> vector<8x8xf32>
    %179 = arith.index_cast %c3_i32 : i32 to index
    %c0_67 = arith.constant 0 : index
    %c0_68 = arith.constant 0 : index
    %180 = vector.load %arg23[%179, %c0_67, %c0_68] : memref<4x8x1xf32, #tpu.memory_space<vmem>>, vector<1x8x1xf32>
    %181 = vector.shape_cast %180 : vector<1x8x1xf32> to vector<8x1xf32>
    %cst_69 = arith.constant dense<0xFF800000> : vector<8xf32>
    %182 = vector.multi_reduction <maximumf>, %178, %cst_69 [1] : vector<8x8xf32> to vector<8xf32>
    %183 = vector.shape_cast %182 : vector<8xf32> to vector<8x1xf32>
    %184 = arith.maximumf %181, %183 : vector<8x1xf32>
    %185 = arith.subf %181, %184 : vector<8x1xf32>
    %186 = arith.truncf %185 : vector<8x1xf32> to vector<8x1xbf16>
    %187 = math.exp %186 : vector<8x1xbf16>
    %188 = arith.extf %187 : vector<8x1xbf16> to vector<8x1xf32>
    %189 = vector.broadcast %184 : vector<8x1xf32> to vector<8x8xf32>
    %190 = arith.subf %178, %189 : vector<8x8xf32>
    %191 = arith.truncf %190 : vector<8x8xf32> to vector<8x8xbf16>
    %192 = math.exp %191 : vector<8x8xbf16>
    %193 = arith.index_cast %c3_i32 : i32 to index
    %c0_70 = arith.constant 0 : index
    %c0_71 = arith.constant 0 : index
    %194 = vector.load %arg24[%193, %c0_70, %c0_71] : memref<4x8x1xf32, #tpu.memory_space<vmem>>, vector<1x8x1xf32>
    %195 = vector.shape_cast %194 : vector<1x8x1xf32> to vector<8x1xf32>
    %196 = arith.mulf %188, %195 : vector<8x1xf32>
    %197 = arith.extf %192 : vector<8x8xbf16> to vector<8x8xf32>
    %cst_72 = arith.constant dense<0.000000e+00> : vector<8xf32>
    %198 = vector.multi_reduction <add>, %197, %cst_72 [1] : vector<8x8xf32> to vector<8xf32>
    %199 = vector.shape_cast %198 : vector<8xf32> to vector<8x1xf32>
    %200 = arith.addf %196, %199 : vector<8x1xf32>
    %201 = arith.index_cast %c3_i32 : i32 to index
    %c0_73 = arith.constant 0 : index
    %c0_74 = arith.constant 0 : index
    %202 = vector.load %arg24[%201, %c0_73, %c0_74] : memref<4x8x1xf32, #tpu.memory_space<vmem>>, vector<1x8x1xf32>
    %203 = vector.shape_cast %202 : vector<1x8x1xf32> to vector<8x1xf32>
    %204 = vector.shape_cast %200 : vector<8x1xf32> to vector<1x8x1xf32>
    tpu.vector_store %arg24[%201, %c0_73, %c0_74], %204 {strides = array<i32>} : memref<4x8x1xf32, #tpu.memory_space<vmem>>, vector<1x8x1xf32>,
    %205 = arith.index_cast %c3_i32 : i32 to index
    %c0_75 = arith.constant 0 : index
    %c0_76 = arith.constant 0 : index
    %206 = vector.load %arg25[%205, %c0_75, %c0_76] : memref<4x8x8xf32, #tpu.memory_space<vmem>>, vector<1x8x8xf32>
    %207 = vector.shape_cast %206 : vector<1x8x8xf32> to vector<8x8xf32>
    %208 = vector.broadcast %188 : vector<8x1xf32> to vector<8x8xf32>
    %209 = arith.mulf %208, %207 : vector<8x8xf32>
    %cst_77 = arith.constant dense<0.000000e+00> : vector<8x8xf32>
    %210 = tpu.matmul %192, %177, %cst_77 {dimension_numbers = #tpu.dot_dimension_numbers<[1], [0], [0], [1], [0, 0, 1, 1], [], []>} : vector<8x8xbf16>, vector<8x8xbf16>, vector<8x8xf32> -> vector<8x8xf32>
    %211 = arith.addf %209, %210 : vector<8x8xf32>
    %212 = arith.index_cast %c3_i32 : i32 to index
    %c0_78 = arith.constant 0 : index
    %c0_79 = arith.constant 0 : index
    %213 = vector.load %arg25[%212, %c0_78, %c0_79] : memref<4x8x8xf32, #tpu.memory_space<vmem>>, vector<1x8x8xf32>
    %214 = vector.shape_cast %213 : vector<1x8x8xf32> to vector<8x8xf32>
    %215 = vector.shape_cast %211 : vector<8x8xf32> to vector<1x8x8xf32>
    tpu.vector_store %arg25[%212, %c0_78, %c0_79], %215 {strides = array<i32>} : memref<4x8x8xf32, #tpu.memory_space<vmem>>, vector<1x8x8xf32>,
    %216 = arith.index_cast %c3_i32 : i32 to index
    %c0_80 = arith.constant 0 : index
    %c0_81 = arith.constant 0 : index
    %217 = vector.load %arg23[%216, %c0_80, %c0_81] : memref<4x8x1xf32, #tpu.memory_space<vmem>>, vector<1x8x1xf32>
    %218 = vector.shape_cast %217 : vector<1x8x1xf32> to vector<8x1xf32>
    %219 = vector.shape_cast %184 : vector<8x1xf32> to vector<1x8x1xf32>
    tpu.vector_store %arg23[%216, %c0_80, %c0_81], %219 {strides = array<i32>} : memref<4x8x1xf32, #tpu.memory_space<vmem>>, vector<1x8x1xf32>,
    %c4_i32 = arith.constant 4 : i32
    %c0_i32_82 = arith.constant 0 : i32
    %220 = arith.cmpi eq, %arg2, %c0_i32_82 : i32
    %221 = arith.extui %220 : i1 to i32
    %c0_i32_83 = arith.constant 0 : i32
    %222 = arith.cmpi ne, %221, %c0_i32_83 : i32
    scf.if %222 {
      %c0_84 = arith.constant 0 : index
      %c0_85 = arith.constant 0 : index
      %c0_86 = arith.constant 0 : index
      %223 = vector.load %arg3[%c0_84, %c0_85, %c0_86] : memref<1x8x32xf32, #tpu.memory_space<vmem>>, vector<1x8x32xf32>
      %224 = vector.shape_cast %223 : vector<1x8x32xf32> to vector<8x32xf32>
      %c0_87 = arith.constant 0 : index
      %c0_88 = arith.constant 0 : index
      %c0_89 = arith.constant 0 : index
      %225 = vector.load %arg25[%c0_87, %c0_88, %c0_89] : memref<4x8x8xf32, #tpu.memory_space<vmem>>, vector<1x8x8xf32>
      %226 = vector.shape_cast %225 : vector<1x8x8xf32> to vector<8x8xf32>
      %c0_90 = arith.constant 0 : index
      %c0_91 = arith.constant 0 : index
      %c0_92 = arith.constant 0 : index
      %227 = vector.load %arg24[%c0_90, %c0_91, %c0_92] : memref<4x8x1xf32, #tpu.memory_space<vmem>>, vector<1x8x1xf32>
      %228 = vector.shape_cast %227 : vector<1x8x1xf32> to vector<8x1xf32>
      %229 = tpu.reciprocal %228 {approx = true} : vector<8x1xf32> -> vector<8x1xf32>
      %230 = vector.broadcast %229 : vector<8x1xf32> to vector<8x8xf32>
      %231 = arith.mulf %226, %230 : vector<8x8xf32>
      %232 = arith.truncf %231 : vector<8x8xf32> to vector<8x8xbf16>
      %c1 = arith.constant 1 : index
      %c0_93 = arith.constant 0 : index
      %c0_94 = arith.constant 0 : index
      %233 = vector.load %arg25[%c1, %c0_93, %c0_94] : memref<4x8x8xf32, #tpu.memory_space<vmem>>, vector<1x8x8xf32>
      %234 = vector.shape_cast %233 : vector<1x8x8xf32> to vector<8x8xf32>
      %c1_95 = arith.constant 1 : index
      %c0_96 = arith.constant 0 : index
      %c0_97 = arith.constant 0 : index
      %235 = vector.load %arg24[%c1_95, %c0_96, %c0_97] : memref<4x8x1xf32, #tpu.memory_space<vmem>>, vector<1x8x1xf32>
      %236 = vector.shape_cast %235 : vector<1x8x1xf32> to vector<8x1xf32>
      %237 = tpu.reciprocal %236 {approx = true} : vector<8x1xf32> -> vector<8x1xf32>
      %238 = vector.broadcast %237 : vector<8x1xf32> to vector<8x8xf32>
      %239 = arith.mulf %234, %238 : vector<8x8xf32>
      %240 = arith.truncf %239 : vector<8x8xf32> to vector<8x8xbf16>
      %c2 = arith.constant 2 : index
      %c0_98 = arith.constant 0 : index
      %c0_99 = arith.constant 0 : index
      %241 = vector.load %arg25[%c2, %c0_98, %c0_99] : memref<4x8x8xf32, #tpu.memory_space<vmem>>, vector<1x8x8xf32>
      %242 = vector.shape_cast %241 : vector<1x8x8xf32> to vector<8x8xf32>
      %c2_100 = arith.constant 2 : index
      %c0_101 = arith.constant 0 : index
      %c0_102 = arith.constant 0 : index
      %243 = vector.load %arg24[%c2_100, %c0_101, %c0_102] : memref<4x8x1xf32, #tpu.memory_space<vmem>>, vector<1x8x1xf32>
      %244 = vector.shape_cast %243 : vector<1x8x1xf32> to vector<8x1xf32>
      %245 = tpu.reciprocal %244 {approx = true} : vector<8x1xf32> -> vector<8x1xf32>
      %246 = vector.broadcast %245 : vector<8x1xf32> to vector<8x8xf32>
      %247 = arith.mulf %242, %246 : vector<8x8xf32>
      %248 = arith.truncf %247 : vector<8x8xf32> to vector<8x8xbf16>
      %c3 = arith.constant 3 : index
      %c0_103 = arith.constant 0 : index
      %c0_104 = arith.constant 0 : index
      %249 = vector.load %arg25[%c3, %c0_103, %c0_104] : memref<4x8x8xf32, #tpu.memory_space<vmem>>, vector<1x8x8xf32>
      %250 = vector.shape_cast %249 : vector<1x8x8xf32> to vector<8x8xf32>
      %c3_105 = arith.constant 3 : index
      %c0_106 = arith.constant 0 : index
      %c0_107 = arith.constant 0 : index
      %251 = vector.load %arg24[%c3_105, %c0_106, %c0_107] : memref<4x8x1xf32, #tpu.memory_space<vmem>>, vector<1x8x1xf32>
      %252 = vector.shape_cast %251 : vector<1x8x1xf32> to vector<8x1xf32>
      %253 = tpu.reciprocal %252 {approx = true} : vector<8x1xf32> -> vector<8x1xf32>
      %254 = vector.broadcast %253 : vector<8x1xf32> to vector<8x8xf32>
      %255 = arith.mulf %250, %254 : vector<8x8xf32>
      %256 = arith.truncf %255 : vector<8x8xf32> to vector<8x8xbf16>
      %257 = tpu.concatenate %232, %240, %248, %256 in 1 : vector<8x8xbf16>, vector<8x8xbf16>, vector<8x8xbf16>, vector<8x8xbf16> -> vector<8x32xbf16>
      %c0_108 = arith.constant 0 : index
      %c0_109 = arith.constant 0 : index
      %258 = vector.load %arg11[%c0_108, %c0_109] : memref<32x32xbf16, #tpu.memory_space<vmem>>, vector<32x32xbf16>
      %cst_110 = arith.constant dense<0.000000e+00> : vector<8x32xf32>
      %259 = tpu.matmul %257, %258, %cst_110 {dimension_numbers = #tpu.dot_dimension_numbers<[1], [0], [0], [1], [0, 0, 1, 1], [], []>} : vector<8x32xbf16>, vector<32x32xbf16>, vector<8x32xf32> -> vector<8x32xf32>
      %260 = arith.addf %224, %259 : vector<8x32xf32>
      %c0_111 = arith.constant 0 : index
      %c0_112 = arith.constant 0 : index
      %261 = vector.load %arg12[%c0_111, %c0_112] : memref<1x32xf32, #tpu.memory_space<vmem>>, vector<1x32xf32>
      %262 = vector.broadcast %261 : vector<1x32xf32> to vector<8x32xf32>
      %263 = arith.addf %260, %262 : vector<8x32xf32>
      %c0_113 = arith.constant 0 : index
      %c0_114 = arith.constant 0 : index
      %264 = vector.load %arg13[%c0_113, %c0_114] : memref<1x32xf32, #tpu.memory_space<vmem>>, vector<1x32xf32>
      %c0_115 = arith.constant 0 : index
      %c0_116 = arith.constant 0 : index
      %265 = vector.load %arg14[%c0_115, %c0_116] : memref<1x32xf32, #tpu.memory_space<vmem>>, vector<1x32xf32>
      %cst_117 = arith.constant dense<0.000000e+00> : vector<8xf32>
      %266 = vector.multi_reduction <add>, %263, %cst_117 [1] : vector<8x32xf32> to vector<8xf32>
      %267 = vector.shape_cast %266 : vector<8xf32> to vector<8x1xf32>
      %cst_118 = arith.constant 3.125000e-02 : f32
      %268 = vector.broadcast %cst_118 : f32 to vector<8x1xf32>
      %269 = arith.mulf %267, %268 : vector<8x1xf32>
      %270 = vector.broadcast %269 : vector<8x1xf32> to vector<8x32xf32>
      %271 = arith.subf %263, %270 : vector<8x32xf32>
      %272 = arith.mulf %271, %271 : vector<8x32xf32>
      %cst_119 = arith.constant dense<0.000000e+00> : vector<8xf32>
      %273 = vector.multi_reduction <add>, %272, %cst_119 [1] : vector<8x32xf32> to vector<8xf32>
      %274 = vector.shape_cast %273 : vector<8xf32> to vector<8x1xf32>
      %cst_120 = arith.constant 0.0322580636 : f32
      %275 = vector.broadcast %cst_120 : f32 to vector<8x1xf32>
      %276 = arith.mulf %274, %275 : vector<8x1xf32>
      %277 = math.sqrt %276 : vector<8x1xf32>
      %cst_121 = arith.constant 9.99999997E-7 : f32
      %278 = vector.broadcast %cst_121 : f32 to vector<8x1xf32>
      %279 = arith.addf %277, %278 : vector<8x1xf32>
      %280 = tpu.reciprocal %279 : vector<8x1xf32> -> vector<8x1xf32>
      %281 = vector.broadcast %264 : vector<1x32xf32> to vector<8x32xf32>
      %282 = arith.mulf %281, %271 : vector<8x32xf32>
      %283 = vector.broadcast %280 : vector<8x1xf32> to vector<8x32xf32>
      %284 = arith.mulf %282, %283 : vector<8x32xf32>
      %285 = vector.broadcast %265 : vector<1x32xf32> to vector<8x32xf32>
      %286 = arith.addf %284, %285 : vector<8x32xf32>
      %287 = arith.truncf %286 : vector<8x32xf32> to vector<8x32xbf16>
      %c0_122 = arith.constant 0 : index
      %c0_123 = arith.constant 0 : index
      %288 = vector.load %arg15[%c0_122, %c0_123] : memref<32x64xbf16, #tpu.memory_space<vmem>>, vector<32x64xbf16>
      %cst_124 = arith.constant dense<0.000000e+00> : vector<8x64xf32>
      %289 = tpu.matmul %287, %288, %cst_124 {dimension_numbers = #tpu.dot_dimension_numbers<[1], [0], [0], [1], [0, 0, 1, 1], [], []>} : vector<8x32xbf16>, vector<32x64xbf16>, vector<8x64xf32> -> vector<8x64xf32>
      %c0_125 = arith.constant 0 : index
      %c0_126 = arith.constant 0 : index
      %290 = vector.load %arg16[%c0_125, %c0_126] : memref<1x64xf32, #tpu.memory_space<vmem>>, vector<1x64xf32>
      %291 = vector.broadcast %290 : vector<1x64xf32> to vector<8x64xf32>
      %292 = arith.addf %289, %291 : vector<8x64xf32>
      %cst_127 = arith.constant 0.000000e+00 : f32
      %293 = vector.broadcast %cst_127 : f32 to vector<8x64xf32>
      %294 = arith.maximumf %292, %293 : vector<8x64xf32>
      %295 = arith.truncf %294 : vector<8x64xf32> to vector<8x64xbf16>
      %c0_128 = arith.constant 0 : index
      %c0_129 = arith.constant 0 : index
      %296 = vector.load %arg17[%c0_128, %c0_129] : memref<64x32xbf16, #tpu.memory_space<vmem>>, vector<64x32xbf16>
      %cst_130 = arith.constant dense<0.000000e+00> : vector<8x32xf32>
      %297 = tpu.matmul %295, %296, %cst_130 {dimension_numbers = #tpu.dot_dimension_numbers<[1], [0], [0], [1], [0, 0, 1, 1], [], []>} : vector<8x64xbf16>, vector<64x32xbf16>, vector<8x32xf32> -> vector<8x32xf32>
      %c0_131 = arith.constant 0 : index
      %c0_132 = arith.constant 0 : index
      %298 = vector.load %arg18[%c0_131, %c0_132] : memref<1x32xf32, #tpu.memory_space<vmem>>, vector<1x32xf32>
      %299 = vector.broadcast %298 : vector<1x32xf32> to vector<8x32xf32>
      %300 = arith.addf %297, %299 : vector<8x32xf32>
      %301 = arith.addf %263, %300 : vector<8x32xf32>
      %c0_133 = arith.constant 0 : index
      %c0_134 = arith.constant 0 : index
      %c0_135 = arith.constant 0 : index
      %302 = vector.load %arg19[%c0_133, %c0_134, %c0_135] : memref<1x8x32xf32, #tpu.memory_space<vmem>>, vector<1x8x32xf32>
      %303 = vector.shape_cast %302 : vector<1x8x32xf32> to vector<8x32xf32>
      %304 = vector.shape_cast %301 : vector<8x32xf32> to vector<1x8x32xf32>
      tpu.vector_store %arg19[%c0_133, %c0_134, %c0_135], %304 {strides = array<i32>} : memref<1x8x32xf32, #tpu.memory_space<vmem>>, vector<1x8x32xf32>,
    } else {
    }
    return
  }
  func.func @transform_0(%arg0: i32, %arg1: i32, %arg2: i32) -> (i32, i32, i32) {
    %c0_i32 = arith.constant 0 : i32
    %c0_i32_0 = arith.constant 0 : i32
    return %arg0, %arg1, %c0_i32 : i32, i32, i32
  }
  func.func @transform_1(%arg0: i32, %arg1: i32, %arg2: i32) -> (i32, i32, i32) {
    %c0_i32 = arith.constant 0 : i32
    %0 = arith.cmpi eq, %arg1, %c0_i32 : i32
    %c0_i32_0 = arith.constant 0 : i32
    %1 = arith.select %0, %arg2, %c0_i32_0 : i32
    %c0_i32_1 = arith.constant 0 : i32
    %c0_i32_2 = arith.constant 0 : i32
    return %arg0, %1, %c0_i32_1 : i32, i32, i32
  }
  func.func @transform_2(%arg0: i32, %arg1: i32, %arg2: i32) -> (i32, i32) {
    %c0_i32 = arith.constant 0 : i32
    %c0_i32_0 = arith.constant 0 : i32
    %c0_i32_1 = arith.constant 0 : i32
    return %c0_i32, %c0_i32_0 : i32, i32
  }
  func.func @transform_3(%arg0: i32, %arg1: i32, %arg2: i32) -> (i32, i32) {
    %c0_i32 = arith.constant 0 : i32
    %c0_i32_0 = arith.constant 0 : i32
    %c0_i32_1 = arith.constant 0 : i32
    return %c0_i32, %c0_i32_0 : i32, i32
  }
  func.func @transform_4(%arg0: i32, %arg1: i32, %arg2: i32) -> (i32, i32) {
    %c0_i32 = arith.constant 0 : i32
    %c0_i32_0 = arith.constant 0 : i32
    %c0_i32_1 = arith.constant 0 : i32
    return %c0_i32, %c0_i32_0 : i32, i32
  }
  func.func @transform_5(%arg0: i32, %arg1: i32, %arg2: i32) -> (i32, i32) {
    %c0_i32 = arith.constant 0 : i32
    %c0_i32_0 = arith.constant 0 : i32
    %c0_i32_1 = arith.constant 0 : i32
    return %c0_i32, %c0_i32_0 : i32, i32
  }
  func.func @transform_6(%arg0: i32, %arg1: i32, %arg2: i32) -> (i32, i32) {
    %c0_i32 = arith.constant 0 : i32
    %c0_i32_0 = arith.constant 0 : i32
    %c0_i32_1 = arith.constant 0 : i32
    return %c0_i32, %c0_i32_0 : i32, i32
  }
  func.func @transform_7(%arg0: i32, %arg1: i32, %arg2: i32) -> (i32, i32) {
    %c0_i32 = arith.constant 0 : i32
    %c0_i32_0 = arith.constant 0 : i32
    %c0_i32_1 = arith.constant 0 : i32
    return %c0_i32, %c0_i32_0 : i32, i32
  }
  func.func @transform_8(%arg0: i32, %arg1: i32, %arg2: i32) -> (i32, i32) {
    %c0_i32 = arith.constant 0 : i32
    %c0_i32_0 = arith.constant 0 : i32
    %c0_i32_1 = arith.constant 0 : i32
    return %c0_i32, %c0_i32_0 : i32, i32
  }
  func.func @transform_9(%arg0: i32, %arg1: i32, %arg2: i32) -> (i32, i32) {
    %c0_i32 = arith.constant 0 : i32
    %c0_i32_0 = arith.constant 0 : i32
    %c0_i32_1 = arith.constant 0 : i32
    return %c0_i32, %c0_i32_0 : i32, i32
  }
  func.func @transform_10(%arg0: i32, %arg1: i32, %arg2: i32) -> (i32, i32) {
    %c0_i32 = arith.constant 0 : i32
    %c0_i32_0 = arith.constant 0 : i32
    %c0_i32_1 = arith.constant 0 : i32
    return %c0_i32, %c0_i32_0 : i32, i32
  }
  func.func @transform_11(%arg0: i32, %arg1: i32, %arg2: i32) -> (i32, i32) {
    %c0_i32 = arith.constant 0 : i32
    %c0_i32_0 = arith.constant 0 : i32
    %c0_i32_1 = arith.constant 0 : i32
    return %c0_i32, %c0_i32_0 : i32, i32
  }
  func.func @transform_12(%arg0: i32, %arg1: i32, %arg2: i32) -> (i32, i32) {
    %c0_i32 = arith.constant 0 : i32
    %c0_i32_0 = arith.constant 0 : i32
    %c0_i32_1 = arith.constant 0 : i32
    return %c0_i32, %c0_i32_0 : i32, i32
  }
  func.func @transform_13(%arg0: i32, %arg1: i32, %arg2: i32) -> (i32, i32) {
    %c0_i32 = arith.constant 0 : i32
    %c0_i32_0 = arith.constant 0 : i32
    %c0_i32_1 = arith.constant 0 : i32
    return %c0_i32, %c0_i32_0 : i32, i32
  }
  func.func @transform_14(%arg0: i32, %arg1: i32, %arg2: i32) -> (i32, i32) {
    %c0_i32 = arith.constant 0 : i32
    %c0_i32_0 = arith.constant 0 : i32
    %c0_i32_1 = arith.constant 0 : i32
    return %c0_i32, %c0_i32_0 : i32, i32
  }
  func.func @transform_15(%arg0: i32, %arg1: i32, %arg2: i32) -> (i32, i32) {
    %c0_i32 = arith.constant 0 : i32
    %c0_i32_0 = arith.constant 0 : i32
    %c0_i32_1 = arith.constant 0 : i32
    return %c0_i32, %c0_i32_0 : i32, i32
  }
  func.func @transform_16(%arg0: i32, %arg1: i32, %arg2: i32) -> (i32, i32, i32) {
    %c0_i32 = arith.constant 0 : i32
    %c0_i32_0 = arith.constant 0 : i32
    return %arg0, %arg1, %c0_i32 : i32, i32, i32
  }
}

</mosaic_0001>

<bundles_post_ra>
// kernel: tpu_custom_call.1
= control target key start
LH: loop header
LB: loop body
LE: loop exit
PB: predicated region body
PF: predicated region fallthrough
CT: control target
= control target key end

     0   :  { %s3248_s0 = inlined_call_operand.vmem [shape: f32[2,8,32], index: 0, kind: input, shape index: {}]   ;;  %s3249_s1 = inlined_call_operand.vmem [shape: f32[2,8,32], index: 1, kind: input, shape index: {}]   ;;  %s3250_s2 = inlined_call_operand.vmem [shape: f32[1,32], index: 2, kind: input, shape index: {}]   ;;  %s3251_s3 = inlined_call_operand.vmem [shape: f32[1,32], index: 3, kind: input, shape index: {}]   ;;  %s3252_s4 = inlined_call_operand.vmem [shape: bf16[32,32], index: 4, kind: input, shape index: {}]   ;;  %s3253_s5 = inlined_call_operand.hbm [shape: f32[1,32], index: 5, kind: input, shape index: {}]   ;;  %s3254_s6 = inlined_call_operand.hbm [shape: bf16[32,64], index: 6, kind: input, shape index: {}]   ;;  %s3255_s7 = inlined_call_operand.hbm [shape: f32[1,64], index: 7, kind: input, shape index: {}]   ;;  %s3256_s8 = inlined_call_operand.hbm [shape: bf16[32,32], index: 8, kind: input, shape index: {}]   ;;  %s3257_s9 = inlined_call_operand.hbm [shape: f32[1,32], index: 9, kind: input, shape index: {}]   ;;  %s3258_s10 = inlined_call_operand.vmem [shape: f32[1,32], index: 10, kind: input, shape index: {}]   ;;  %s3259_s11 = inlined_call_operand.vmem [shape: f32[1,32], index: 11, kind: input, shape index: {}]   ;;  %s3260_s12 = inlined_call_operand.vmem [shape: bf16[32,64], index: 12, kind: input, shape index: {}]   ;;  %s3261_s13 = inlined_call_operand.vmem [shape: f32[1,64], index: 13, kind: input, shape index: {}]   ;;  %s3262_s14 = inlined_call_operand.vmem [shape: bf16[64,32], index: 14, kind: input, shape index: {}]   ;;  %s3263_s15 = inlined_call_operand.vmem [shape: f32[1,32], index: 15, kind: input, shape index: {}]   ;;  %s3264_s16 = inlined_call_operand.hbm [shape: f32[2,8,32], index: 16, kind: output, shape index: {}]  }
   0x1   :  { %3280 = sst [smem:[#allocation31_spill]] %s3248_s0 }
   0x2   :  { %3281 = sst [smem:[#allocation32_spill]] %s3254_s6 }
   0x3   :  { %3282 = sst [smem:[#allocation33_spill]] %s3259_s11 }
   0x4   :  { %3283 = sst [smem:[#allocation34_spill]] %s3261_s13 }
   0x5   :  { %3284 = sst [smem:[#allocation35_spill]] %s3263_s15 }
   0x6   :  { %3285 = sst [smem:[#allocation36_spill]] %s3264_s16 }
   0x7   :  { %21 = vsyncpa [#allocation9], 0 }
   0x8   :  { %22 = vsyncpa [#allocation12], 0 }
   0x9   :  { %23 = vsyncpa [#allocation15], 0 }
   0xa   :  { %24 = vsyncpa [#allocation10], 0 }
   0xb   :  { %26 = vsyncpa [#allocation10 + $0x1], 0  ;;  %s2775_s21 = smov 0   ;;  %s2777_s22 = smov 0  }
   0xc   :  { %s2779_s23 = smov 0   ;;  %s2781_s24 = smov 0  }
   0xd   :  { %s2783_s25 = smov 0   ;;  %s2785_s26 = smov 0  }
   0xe LB: > { %3286 = sst [smem:[#allocation22_spill]] %s2646_s21  ;;  %s2060_s27 = sadd.s32 4294967295, %s2666_s26   ;;  %s2666_s26 = sphi %s2785_s26, %s32_s26   ;;  %s2662_s25 = sphi %s2783_s25, %s3320_s25   ;;  %s2658_s24 = sphi %s2781_s24, %s3319_s24   ;;  %s2654_s23 = sphi %s2779_s23, %s3318_s23   ;;  %s2650_s22 = sphi %s2777_s22, %s3317_s22   ;;  %s2646_s21 = sphi %s2775_s21, %s3316_s21  }
   0xf   : > { %3287 = sst [smem:[#allocation23_spill]] %s2650_s22  ;;  %s2061_s28 = sadd.s32 4294967294, %s2666_s26  }
  0x10   : > { %3288 = sst [smem:[#allocation24_spill]] %s2654_s23  ;;  %s51_s29 = sadd.s32 1, %s2662_s25 }
  0x11   : > { %3289 = sst [smem:[#allocation25_spill]] %s2662_s25  ;;  %s414_s30 = sadd.s32 1, %s2654_s23 }
  0x12   : > { %3290 = sst [smem:[#allocation26_spill]] %s2666_s26  ;;  %p53_p0 = scmp.ge.s32.totalorder %s51_s29, 2 }
  0x13   : > { %p424_p1 = scmp.ne.s32.totalorder %s2654_s23, %s2650_s22  ;;  %p425_p2 = scmp.eq.s32.totalorder %s2060_s27, 1 }
  0x14   : > { %p430_p3 = scmp.ne.s32.totalorder %s2650_s22, %s2646_s21  ;;  %s3322_s29 = smov (%p53_p0, %s51_s29), 0 }
  0x15   : > { %3291 = sst [smem:[#allocation27_spill]] %s3322_s29  ;;  %p2815_p4 = por %p425_p2, %p424_p1 }
  0x16   : > { %p431_p5 = scmp.eq.s32.totalorder %s2061_s28, 1  ;;  %s409_s17 = ssub.s32 %s2662_s25, %s3322_s29 }
  0x17   : > { %s3292_s0 = scalar_select %p2815_p4, 1, 0 }
  0x18   : > { %p2062_p6 = scmp.ge.s32.totalorder %s2666_s26, 1  ;;  %p412_p7 = scmp.eq.s32.totalorder %s409_s17, 0 }
  0x19   : > { %3293 = sst [smem:[#allocation28_spill]] %s3292_s0  ;;  %p2822_p8 = por %p431_p5, %p430_p3 }
  0x1a   : > { %p438_p9 = scmp.lt.s32.totalorder %s2666_s26, 3  ;;  %p2834_p11 = scmp.eq.s32.totalorder %s2060_s27, 0 }
  0x1b   : > { %s3294_s18 = scalar_select %p2822_p8, 1, 0 }
  0x1c   : > { %s2828_s19 = scalar_select %p412_p7, %s2654_s23, %s414_s30  }
  0x1d   : > { %3295 = sst [smem:[#allocation29_spill]] %s3294_s18  ;;  %p2830_p10 = pnand %p2062_p6, %p438_p9 }
  0x1e   : > { %3296 = sst [smem:[#allocation30_spill]] %s2828_s19  ;;  %s2668_s28 = smov [#allocation11]  }
  0x1f   : > { %s3297_s20 = scalar_select %p2830_p10, 1, 0 }
  0x20   : > { %s3298_s21 = scalar_select %p2834_p11, 1, 0 }
  0x21   : > { %p2281_p12 = pneg %p2830_p10  ;;  %s470_s17 = sshll.u32 %s2668_s28, 4  ;;  %s471_s17 = int_to_ptr.vmem [resolvable:$true] %s470_s17 }
  0x22   : > { %s2669_s30 = smov [#allocation14]   ;;  %s3300_s6 = sld [smem:[#allocation32_spill]] }
  0x23   : > { %p2842_p13 = pnand %p2834_p11, %p2281_p12  ;;  %s494_s25 = sshll.u32 %s2669_s30, 4  ;;  %s2846_s25 = int_to_ptr.vmem [resolvable:$true] %s494_s25 }
  0x25   : > { %p2856_p1 = pneg %p2842_p13 }
  0x28   : > { %s2436_s23 = scalar_lea.hbm %s3300_s6, 256 }
  0x29   : > { %p2437_p0 = scmp.ne.s32.totalorder %s3300_s6, %s2436_s23  ;;  %p2443_p5 = scmp.lt.u32.totalorder %s2436_s23, %s3300_s6 }
  0x2b   : > { %p2439_p2 = pnand %p2856_p1, %p2437_p0 }
  0x2d   : > { %p2440_p3 = pneg %p2439_p2 }
  0x2f   : > { %p2445_p6 = pnand %p2443_p5, %p2440_p3 }
  0x31   : > { %2448 = shalt.err (!%p2445_p6)
}
  0x32   : > { %s2449_s19 = scalar_lea.vmem %s471_s17, 256  ;;  %p2457_p8 = scmp.lt.s32.totalorder %s471_s17, %s471_s17 }
  0x33   : > { %p2450_p7 = scmp.ne.s32.totalorder %s471_s17, %s2449_s19  ;;  %p2458_p4 = scmp.lt.s32.totalorder %s2449_s19, %s2449_s19 }
  0x35   : > { %p2452_p9 = pnand %p2450_p7, %p2856_p1  ;;  %p2459_p11 = por %p2458_p4, %p2457_p8 }
  0x37   : > { %p2453_p12 = pneg %p2452_p9 }
  0x39   : > { %p2460_p10 = pnand %p2459_p11, %p2453_p12 }
  0x3b   : > { %2463 = shalt.err (!%p2460_p10)
}
  0x3c   : > { %s2670_s26 = smov 64   ;;  %s2671_s18 = smov 4  }
  0x3d   : > { %2287 = dma.hbm_to_vmem [thread:$0]  (!%p2842_p13), %s3300_s6, 256, %s471_s17, [#allocation12], %s2670_s26, %s2670_s26, %s2671_s18  }
  0x3e   : > { %s2464_s0 = scalar_lea.hbm %s3256_s8, 256 }
  0x3f   : > { %p2465_p0 = scmp.ne.s32.totalorder %s3256_s8, %s2464_s0  ;;  %p2471_p10 = scmp.lt.u32.totalorder %s2464_s0, %s3256_s8 }
  0x41   : > { %p2467_p4 = pnand %p2465_p0, %p2856_p1 }
  0x43   : > { %p2468_p8 = pneg %p2467_p4 }
  0x45   : > { %p2473_p11 = pnand %p2471_p10, %p2468_p8 }
  0x47   : > { %2476 = shalt.err (!%p2473_p11)
}
  0x48   : > { %s2477_s17 = scalar_lea.vmem %s2846_s25, 256  ;;  %p2485_p6 = scmp.lt.s32.totalorder %s2846_s25, %s2846_s25 }
  0x49   : > { %p2478_p2 = scmp.ne.s32.totalorder %s2846_s25, %s2477_s17  ;;  %p2486_p7 = scmp.lt.s32.totalorder %s2477_s17, %s2477_s17 }
  0x4b   : > { %p2480_p3 = pnand %p2478_p2, %p2856_p1  ;;  %p2487_p9 = por %p2486_p7, %p2485_p6 }
  0x4d   : > { %p2481_p5 = pneg %p2480_p3 }
  0x4f   : > { %p2488_p12 = pnand %p2487_p9, %p2481_p5 }
  0x51   : > { %2491 = shalt.err (!%p2488_p12)
}
  0x52   : > { %2293 = dma.hbm_to_vmem [thread:$0]  (!%p2842_p13), %s3256_s8, 256, %s2846_s25, [#allocation15], %s2670_s26, %s2670_s26, %s2671_s18  }
  0x53   : > { %s2672_s22 = smov [#allocation8]   ;;  %s2673_s16 = smov [#allocation13]  }
  0x54   : > { %s460_s0 = sshll.u32 %s2672_s22, 4  ;;  %s484_s23 = sshll.u32 %s2673_s16, 4  ;;  %s461_s0 = int_to_ptr.vmem [resolvable:$true] %s460_s0  ;;  %s485_s23 = int_to_ptr.vmem [resolvable:$true] %s484_s23 }
  0x55   : > { %s2492_s19 = scalar_lea.hbm %s3253_s5, 16 }
  0x56   : > { %p2493_p0 = scmp.ne.s32.totalorder %s3253_s5, %s2492_s19  ;;  %p2499_p10 = scmp.lt.u32.totalorder %s2492_s19, %s3253_s5 }
  0x58   : > { %p2495_p4 = pnand %p2493_p0, %p2856_p1 }
  0x5a   : > { %p2496_p8 = pneg %p2495_p4 }
  0x5c   : > { %p2501_p11 = pnand %p2499_p10, %p2496_p8 }
  0x5e   : > { %2504 = shalt.err (!%p2501_p11)
}
  0x5f   : > { %s2505_s25 = scalar_lea.vmem %s461_s0, 16  ;;  %s2512_s26 = scalar_lea.vmem %s461_s0, 32 }
  0x60   : > { %p2506_p2 = scmp.ne.s32.totalorder %s461_s0, %s2505_s25  ;;  %p2513_p6 = scmp.lt.s32.totalorder %s461_s0, %s461_s0 }
  0x61   : > { %p2514_p7 = scmp.lt.s32.totalorder %s2512_s26, %s2505_s25 }
  0x62   : > { %p2508_p3 = pnand %p2506_p2, %p2856_p1 }
  0x63   : > { %p2515_p9 = por %p2514_p7, %p2513_p6 }
  0x64   : > { %p2509_p5 = pneg %p2508_p3 }
  0x66   : > { %p2516_p12 = pnand %p2515_p9, %p2509_p5 }
  0x68   : > { %2519 = shalt.err (!%p2516_p12)
}
  0x69   : > { %2284 = dma.hbm_to_vmem [thread:$0]  (!%p2842_p13), %s3253_s5, 16, %s461_s0, [#allocation9]  }
  0x6a   : > { %s2520_s22 = scalar_lea.hbm %s3255_s7, 16 }
  0x6b   : > { %p2521_p0 = scmp.ne.s32.totalorder %s3255_s7, %s2520_s22  ;;  %p2527_p10 = scmp.lt.u32.totalorder %s2520_s22, %s3255_s7 }
  0x6d   : > { %p2523_p4 = pnand %p2521_p0, %p2856_p1 }
  0x6f   : > { %p2524_p8 = pneg %p2523_p4 }
  0x71   : > { %p2529_p11 = pnand %p2527_p10, %p2524_p8 }
  0x73   : > { %2532 = shalt.err (!%p2529_p11)
}
  0x74   : > { %s2533_s17 = scalar_lea.vmem %s485_s23, 16  ;;  %s2540_s0 = scalar_lea.vmem %s485_s23, 32 }
  0x75   : > { %p2534_p2 = scmp.ne.s32.totalorder %s485_s23, %s2533_s17  ;;  %p2541_p6 = scmp.lt.s32.totalorder %s485_s23, %s485_s23 }
  0x76   : > { %p2542_p7 = scmp.lt.s32.totalorder %s2540_s0, %s2533_s17 }
  0x77   : > { %p2536_p3 = pnand %p2534_p2, %p2856_p1 }
  0x78   : > { %p2543_p9 = por %p2542_p7, %p2541_p6 }
  0x79   : > { %p2537_p5 = pneg %p2536_p3 }
  0x7b   : > { %p2544_p12 = pnand %p2543_p9, %p2537_p5 }
  0x7d   : > { %2547 = shalt.err (!%p2544_p12)
}
  0x7e   : > { %2290 = dma.hbm_to_vmem [thread:$0]  (!%p2842_p13), %s3255_s7, 16, %s485_s23, [#allocation12]  }
  0x7f   : > { %s2674_s26 = smov [#allocation16]   ;;  %s2548_s15 = scalar_lea.hbm %s3257_s9, 16 }
  0x80   : > { %s508_s6 = sshll.u32 %s2674_s26, 4  ;;  %p2549_p0 = scmp.ne.s32.totalorder %s3257_s9, %s2548_s15  ;;  %s509_s6 = int_to_ptr.vmem [resolvable:$true] %s508_s6 }
  0x81   : > { %p2555_p10 = scmp.lt.u32.totalorder %s2548_s15, %s3257_s9 }
  0x82   : > { %p2551_p4 = pnand %p2549_p0, %p2856_p1 }
  0x84   : > { %p2552_p8 = pneg %p2551_p4 }
  0x86   : > { %p2557_p11 = pnand %p2555_p10, %p2552_p8 }
  0x88   : > { %2560 = shalt.err (!%p2557_p11)
}
  0x89   : > { %s2561_s23 = scalar_lea.vmem %s509_s6, 16  ;;  %s2568_s19 = scalar_lea.vmem %s509_s6, 32 }
  0x8a   : > { %p2562_p2 = scmp.ne.s32.totalorder %s509_s6, %s2561_s23  ;;  %p2569_p6 = scmp.lt.s32.totalorder %s509_s6, %s509_s6 }
  0x8b   : > { %p2570_p7 = scmp.lt.s32.totalorder %s2568_s19, %s2561_s23 }
  0x8c   : > { %p2564_p3 = pnand %p2562_p2, %p2856_p1 }
  0x8d   : > { %p2571_p9 = por %p2570_p7, %p2569_p6 }
  0x8e   : > { %p2565_p5 = pneg %p2564_p3 }
  0x90   : > { %p2572_p12 = pnand %p2571_p9, %p2565_p5 }
  0x92   : > { %2575 = shalt.err (!%p2572_p12)
}
  0x93   : > { %2296 = dma.hbm_to_vmem [thread:$0]  (!%p2842_p13), %s3257_s9, 16, %s509_s6, [#allocation15]  }
  0x94   : > { %p3302_p0 = scmp.ne.s32.totalorder %s3297_s20, 0 }
  0x95   : > { %p3303_p4 = scmp.ne.s32.totalorder (!%p3302_p0), %s3298_s21, 0 }
  0x96   : > { %563 = sbr.rel (%p3302_p0) target bundleno = 2771 (0xad3), region = 84 }
  0x9d   : > { %2629 = dma.done.wait (%p3303_p4), [#allocation9], 16  }
  0x9e   : > { %2631 = vsyncadd (%p3303_p4), [#allocation9], 4294967280 }
  0x9f   : > { %2633 = dma.done.wait (%p3303_p4), [#allocation12], 272  }
  0xa0   : > { %2635 = vsyncadd (%p3303_p4), [#allocation12], 4294967024 }
  0xa1   : > { %2637 = dma.done.wait (%p3303_p4), [#allocation15], 272  }
  0xa2   : > { %2639 = vsyncadd (%p3303_p4), [#allocation15], 4294967024  ;;  %p640_p13 = scmp.lt.s32.totalorder %s2658_s24, 1  ;;  %vm666_vm0 = vcmask 261120   ;;  %s3304_s18 = sld [smem:[#allocation31_spill]]  ;;  %v2388_v14 = vld [vmem:[#allocation11] sm:$0xff]  }
  0xa3   : > { %v2675_v15 = vmov 0.0   ;;  %vm2676_vm1 = vmmov 0   ;;  %v2389_v16 = vld [vmem:[#allocation11 + $0x8] sm:$0xff]   ;;  %v2391_v44 = vld [vmem:[%s3252_s4 + $0x8] sm:$0xff]   ;;  %vm964_vm6 = vcmask 64512   ;;  %vm774_vm7 = vcmask 60416  }
  0xa4   : > { %s641_s29 = scalar_select %p640_p13, %s2658_s24, 1  ;;  %2167 = vmatprep.subr.bf16.mxu1 %v2675_v15  ;;  %2171 = vmatprep.mubr.msk.bf16.mxu1 %vm2676_vm1, %v2675_v15  ;;  %v2078_v33 = vld [vmem:[%s3250_s2] ss:$0 sm:$0xff]  ;;  %965 = vst.msk [vmem:[#allocation7] sm:$0xff] %vm964_vm6, %v2675_v15  ;;  %966 = vst.msk [vmem:[#allocation7 + $0x8] sm:$0xff] %vm964_vm6, %v2675_v15  ;;  %vm955_vm8 = vcmask 7168  }
  0xa5   : > { %2168 = vmatpush3.bf16.msra.mxu1 %v2388_v14  ;;  %2183 = vmatprep.subr.bf16.mxu0 %v2675_v15  ;;  %v2079_v36 = vld [vmem:[%s3251_s3] ss:$0 sm:$0xff]  ;;  %967 = vst.msk [vmem:[#allocation7 + $0x10] sm:$0xff] %vm964_vm6, %v2675_v15  ;;  %968 = vst.msk [vmem:[#allocation7 + $0x18] sm:$0xff] %vm964_vm6, %v2675_v15  ;;  %v2080_v47 = vld [vmem:[#allocation13] ss:$0 sm:$0xff] }
  0xa6   : > { %s2076_s20 = sshll.u32 %s641_s29, 3  ;;  %2169 = vmatprep.subr.bf16.mxu1 %v2675_v15  ;;  %2185 = vmatprep.mubr.msk.bf16.mxu0 %vm2676_vm1, %v2675_v15  ;;  %v2390_v41 = vld [vmem:[%s3252_s4] sm:$0xff]   ;;  %s2677_s17 = smov 120   ;;  %v2093_v54 = vld [vmem:[#allocation8] ss:$0 sm:$0xff]  ;;  %960 = vst.msk [vmem:[#allocation6] sm:$0xff] %vm955_vm8, %v2675_v15 }
  0xa7   : > { %s655_s25 = scalar_lea.vmem %s3249_s1, %s2076_s20  ;;  %s2678_s0 = smov 112   ;;  %961 = vst.msk [vmem:[#allocation6 + $0x8] sm:$0xff] %vm955_vm8, %v2675_v15  ;;  %962 = vst.msk [vmem:[#allocation6 + $0x10] sm:$0xff] %vm955_vm8, %v2675_v15  ;;  %vm1066_vm9 = vcmask 1043456   ;;  %vm1598_vm10 = vcmask 130048   ;;  %vm1601_vm11 = vcmask 195584  }
  0xa8   : > { %s646_s11 = scalar_lea.vmem %s3304_s18, %s2076_s20  ;;  %v663_v0 = vld [vmem:[%s655_s25] sm:$0xff]  ;;  %s2679_s29 = smov 104   ;;  %963 = vst.msk [vmem:[#allocation6 + $0x18] sm:$0xff] %vm955_vm8, %v2675_v15  ;;  %vm1816_vm14 = vcmask 523264  }
  0xa9   : > { %v2971_v1 = vld [vmem:[%s646_s11] sm:$0xff]  ;;  %v667_v2 = vsel %vm666_vm0, %v663_v0, 0.0  ;;  %2170 = vmatpush3.bf16.msra.mxu1 %v2389_v16  ;;  %s2682_s20 = smov 96   ;;  %s2683_s28 = smov 88  }
  0xaa   : > { %v832_v3 = vsel %vm666_vm0, %v2971_v1, 0.0  ;;  %668 = vadd.xlane.f32.xlu0 %v667_v2  ;;  %2175 = vmatprep.subr.bf16.mxu1 %v2675_v15  ;;  %s2684_s13 = smov 80   ;;  %s2685_s25 = smov 72  }
  0xab   : > { %s2686_s26 = smov 8   ;;  %s2687_s6 = smov 16  }
  0xac   : > { %s2688_s18 = smov 24   ;;  %s3307_s21 = sld [smem:[#allocation34_spill]] }
  0xad   : > { %s3308_s30 = sld [smem:[#allocation35_spill]]  ;;  %s3309_s23 = sld [smem:[#allocation28_spill]] }
  0xae   : > { %833 = vadd.xlane.f32.xlu0 %v832_v3  ;;  %s2129_s19 = sshll.u32 %s2658_s24, 7 }
  0xb3   : > { %p3311_p8 = scmp.ne.s32.totalorder %s3309_s23, 0 }
 0x137   : > { %v669_v4 = vpop.xlane.xlu0 %668 }
 0x138   : > { %v670_v5 = vmul.f32 0.03125, %v669_v4 }
 0x13a   : > { %v671_v6 = vsub.f32 %v663_v0, %v670_v5 }
 0x13b   : > { %v834_v7 = vpop.xlane.xlu0 %833 }
 0x13c   : > { %v835_v8 = vmul.f32 0.03125, %v834_v7  ;;  %v672_v9 = vmul.f32 %v671_v6, %v671_v6  ;;  %v692_v34 = vmul.f32 %v2078_v33, %v671_v6 }
 0x13e   : > { %v836_v10 = vsub.f32 %v2971_v1, %v835_v8  ;;  %v673_v11 = vsel %vm666_vm0, %v672_v9, 0.0 }
 0x13f   : > { %674 = vadd.xlane.f32.xlu1 %v673_v11 }
 0x140   : > { %v837_v12 = vmul.f32 %v836_v10, %v836_v10  ;;  %v857_v38 = vmul.f32 %v2078_v33, %v836_v10 }
 0x142   : > { %v838_v13 = vsel %vm666_vm0, %v837_v12, 0.0 }
 0x143   : > { %839 = vadd.xlane.f32.xlu1 %v838_v13 }
 0x1cc   : > { %v675_v17 = vpop.xlane.xlu1 %674 }
 0x1cd   : > { %v676_v18 = vmul.f32 0.032258064, %v675_v17 }
 0x1cf   : > { %2400 = vrsqrt.f32 %v676_v18  ;;  %vm679_vm2 = vcmp.eq.f32.partialorder %v676_v18, inf  ;;  %v682_v23 = vand.u32 2147483648, %v676_v18  ;;  %vm681_vm3 = vcmp.eq.f32.partialorder %v676_v18, 0.0 }
 0x1d0   : > { %v840_v19 = vpop.xlane.xlu1 %839 }
 0x1d1   : > { %v841_v20 = vmul.f32 0.032258064, %v840_v19 }
 0x1d3   : > { %2402 = vrsqrt.f32 %v841_v20  ;;  %vm844_vm4 = vcmp.eq.f32.partialorder %v841_v20, inf  ;;  %v847_v29 = vand.u32 2147483648, %v841_v20  ;;  %vm846_vm5 = vcmp.eq.f32.partialorder %v841_v20, 0.0 }
 0x1d9   : > { %v2401_v21 = vpop.eup %2400 }
 0x1da   : > { %v678_v22 = vmul.f32 %v2401_v21, %v676_v18 }
 0x1dc   : > { %v680_v24 = vsel %vm679_vm2, %v676_v18, %v678_v22 }
 0x1dd   : > { %v2403_v25 = vpop.eup %2402  ;;  %v683_v26 = vsel %vm681_vm3, %v682_v23, %v680_v24  ;;  %v2680_v23 = vmov -1e+30   ;;  %v2681_v24 = vmov 0  }
 0x1de   : > { %v684_v27 = vadd.f32 1e-06, %v683_v26  ;;  %v843_v28 = vmul.f32 %v2403_v25, %v841_v20  ;;  %956 = vst.msk [vmem:[#allocation5] sm:$0xff] %vm955_vm8, %v2680_v23  ;;  %957 = vst.msk [vmem:[#allocation5 + $0x8] sm:$0xff] %vm955_vm8, %v2680_v23  ;;  %2381 = vset.pattern.permute.xlu0 %v2681_v24  ;;  %2382 = vset.pattern.permute.xlu1 %v2681_v24 }
 0x1df   : > { %958 = vst.msk [vmem:[#allocation5 + $0x10] sm:$0xff] %vm955_vm8, %v2680_v23  ;;  %959 = vst.msk [vmem:[#allocation5 + $0x18] sm:$0xff] %vm955_vm8, %v2680_v23 }
 0x1e0   : > { %v845_v30 = vsel %vm844_vm4, %v841_v20, %v843_v28  ;;  %2404 = vrcp.f32 %v684_v27 }
 0x1e1   : > { %v848_v31 = vsel %vm846_vm5, %v847_v29, %v845_v30 }
 0x1e2   : > { %v849_v32 = vadd.f32 1e-06, %v848_v31 }
 0x1e4   : > { %2406 = vrcp.f32 %v849_v32 }
 0x1ea   : > { %v2405_v35 = vpop.eup %2404 }
 0x1eb   : > { %v693_v37 = vmul.f32 %v2405_v35, %v692_v34 }
 0x1ed   : > { %v700_v39 = vadd.f32 %v2079_v36, %v693_v37 }
 0x1ee   : > { %v2407_v40 = vpop.eup %2406 }
 0x1ef   : > { %v701_v42 = vpack.c.bf16 %v700_v39, %v700_v39  ;;  %v858_v43 = vmul.f32 %v2407_v40, %v857_v38  ;;  %v1026_v40 = vld [vmem:[#allocation5] sm:$0xff] }
 0x1f1   : > { %2172 = vmatmul.mubr.msk.bf16.vlgmr.msra.gmra.mrb[0].mxu1 %vm666_vm0, %v701_v42  ;;  %v865_v45 = vadd.f32 %v2079_v36, %v858_v43 }
 0x1f2   : > { %2176 = vmatpush3.bf16.msra.mxu1 %v2390_v41  ;;  %2179 = vmatprep.mubr.msk.bf16.mxu1 %vm2676_vm1, %v2675_v15 }
 0x1f3   : > { %2177 = vmatprep.subr.bf16.mxu1 %v2675_v15  ;;  %v866_v46 = vpack.c.bf16 %v865_v45, %v865_v45 }
 0x1f6   : > { %2178 = vmatpush3.bf16.msra.mxu1 %v2391_v44  ;;  %v1169_v44 = vld [vmem:[#allocation5 + $0x8] sm:$0xff] }
 0x1f7   : > { %2189 = vmatprep.subr.bf16.mxu1 %v2675_v15 }
 0x1f9   : > { %2180 = vmatmul.mubr.msk.bf16.vlgmr.msra.gmra.mrb[4].mxu1 %vm666_vm0, %v866_v46 }
 0x1fa   : > { %2191 = vmatprep.mubr.msk.bf16.mxu1 %vm2676_vm1, %v2675_v15 }
 0x2c4   : > { %v762_v48 = vpop.f32.mrb[0].mxu1 }
 0x2c5   : > { %v763_v49 = vadd.f32 %v2080_v47, %v762_v48  ;;  %v2173_v50 = vpop.f32.mrb[1].mxu1  ;;  %v1312_v48 = vld [vmem:[#allocation5 + $0x10] sm:$0xff] }
 0x2c6   : > { %v765_v51 = vpop.f32.mrb[2].mxu1 }
 0x2c7   : > { %v3015_v52 = vpack.c.bf16 %v763_v49, %v763_v49  ;;  %v2174_v53 = vpop.f32.mrb[3].mxu1 }
 0x2c9   : > { %775 = vst.msk [vmem:[#allocation3] sm:$0xf] %vm774_vm7, %v3015_v52  ;;  %785 = vrot.lane.b32.xlu0 %v3015_v52, %s2677_s17  ;;  %798 = vrot.lane.b32.xlu1 %v3015_v52, %s2678_s0 }
 0x2cc   : > { %v927_v55 = vpop.f32.mrb[4].mxu1 }
 0x2cd   : > { %v928_v56 = vadd.f32 %v2093_v54, %v927_v55  ;;  %v2181_v57 = vpop.f32.mrb[5].mxu1 }
 0x2ce   : > { %v930_v58 = vpop.f32.mrb[6].mxu1 }
 0x2cf   : > { %v933_v59 = vmul.f32 0.35355338, %v928_v56  ;;  %v2182_v60 = vpop.f32.mrb[7].mxu1  ;;  %v1455_v56 = vld [vmem:[#allocation5 + $0x18] sm:$0xff] }
 0x2d0   : > { %v975_v61 = vld [vmem:[#allocation3] sm:$0xf] }
 0x2d1   : > { %v934_v62 = vpack.c.bf16 %v933_v59, %v933_v59  ;;  %v984_v63 = vsel %vm964_vm6, %v975_v61, 0 }
 0x2d2   : > { %2184 = vmatpush3.bf16.xpose.msra.mxu0 %v984_v63 }
 0x2d3   : > { %936 = vst.msk [vmem:[#allocation2] sm:$0xf] %vm774_vm7, %v934_v62  ;;  %945 = vrot.lane.b32.xlu0 %v934_v62, %s2678_s0  ;;  %940 = vrot.lane.b32.xlu1 %v934_v62, %s2677_s17 }
 0x2d4   : > { %2195 = vmatprep.subr.bf16.mxu0 %v2675_v15 }
 0x2d7   : > { %811 = vrot.lane.b32.xlu1 %v3015_v52, %s2679_s29 }
 0x2da   : > { %v970_v0 = vld [vmem:[#allocation2] sm:$0xf] }
 0x2db   : > { %950 = vrot.lane.b32.xlu1 %v934_v62, %s2679_s29  ;;  %2186 = vmatmul.mubr.msk.bf16.vlgmr.msra.gmra.mrb[0].mxu0 %vm964_vm6, %v970_v0 }
 0x2dc   : > { %2197 = vmatprep.mubr.msk.bf16.mxu0 %vm2676_vm1, %v2675_v15 }
 0x33b   : > { %v799_v2 = vpop.permute.xlu1 %798  ;;  %v786_v3 = vpop.permute.xlu0 %785 }
 0x33c   : > { %2087 = vst.msk [vmem:[#allocation3 + $0x8] sm:$0xf] %vm774_vm7, %v799_v2  ;;  %2085 = vst.msk [vmem:[#allocation3 + $0x4] sm:$0xf] %vm774_vm7, %v786_v3 }
 0x343   : > { %v2100_v4 = vld [vmem:[#allocation3 + $0x4] sm:$0xf]  ;;  %v2104_v9 = vld [vmem:[#allocation3 + $0x8] sm:$0xf] }
 0x344   : > { %v1126_v5 = vsel %vm964_vm6, %v2100_v4, 0  ;;  %v1269_v12 = vsel %vm964_vm6, %v2104_v9, 0 }
 0x345   : > { %v941_v6 = vpop.permute.xlu1 %940  ;;  %2196 = vmatpush3.bf16.xpose.msra.mxu0 %v1126_v5  ;;  %v946_v7 = vpop.permute.xlu0 %945 }
 0x346   : > { %944 = vst.msk [vmem:[#allocation2 + $0x4] sm:$0xf] %vm774_vm7, %v941_v6  ;;  %949 = vst.msk [vmem:[#allocation2 + $0x8] sm:$0xf] %vm774_vm7, %v946_v7  ;;  %2207 = vmatprep.subr.bf16.mxu0 %v2675_v15 }
 0x349   : > { %v812_v8 = vpop.permute.xlu1 %811 }
 0x34a   : > { %2089 = vst.msk [vmem:[#allocation3 + $0xc] sm:$0xf] %vm774_vm7, %v812_v8 }
 0x34d   : > { %v951_v10 = vpop.permute.xlu1 %950  ;;  %v1114_v11 = vld [vmem:[#allocation2 + $0x4] sm:$0xf]  ;;  %v1257_v14 = vld [vmem:[#allocation2 + $0x8] sm:$0xf] }
 0x34e   : > { %954 = vst.msk [vmem:[#allocation2 + $0xc] sm:$0xf] %vm774_vm7, %v951_v10  ;;  %2198 = vmatmul.mubr.msk.bf16.vlgmr.msra.gmra.mrb[4].mxu0 %vm964_vm6, %v1114_v11 }
 0x34f   : > { %2208 = vmatpush3.bf16.xpose.msra.mxu0 %v1269_v12  ;;  %2209 = vmatprep.mubr.msk.bf16.mxu0 %vm2676_vm1, %v2675_v15 }
 0x350   : > { %2219 = vmatprep.subr.bf16.mxu0 %v2675_v15 }
 0x351   : > { %v2108_v13 = vld [vmem:[#allocation3 + $0xc] sm:$0xf] }
 0x352   : > { %v1412_v16 = vsel %vm964_vm6, %v2108_v13, 0 }
 0x355   : > { %v1400_v17 = vld [vmem:[#allocation2 + $0xc] sm:$0xf] }
 0x356   : > { %2210 = vmatmul.mubr.msk.bf16.vlgmr.msra.gmra.mrb[8].mxu0 %vm964_vm6, %v1257_v14 }
 0x357   : > { %2220 = vmatpush3.bf16.xpose.msra.mxu0 %v1412_v16  ;;  %2221 = vmatprep.mubr.msk.bf16.mxu0 %vm2676_vm1, %v2675_v15 }
 0x358   : > { %2231 = vmatprep.subr.bf16.mxu0 %v2675_v15 }
 0x35e   : > { %2222 = vmatmul.mubr.msk.bf16.vlgmr.msra.gmra.mrb[12].mxu0 %vm964_vm6, %v1400_v17 }
 0x35f   : > { %2235 = vmatprep.mubr.msk.bf16.mxu0 %vm2676_vm1, %v2675_v15 }
 0x3ae   : > { %v3049_v18 = vpop.f32.mrb[0].mxu0 }
 0x3af   : > { %v2187_v19 = vpop.f32.mrb[1].mxu0  ;;  %v1027_v20 = vsel %vm964_vm6, %v3049_v18, -inf }
 0x3b0   : > { %1028 = vmax.xlane.f32.xlu0 %v1027_v20  ;;  %v1023_v21 = vpop.f32.mrb[2].mxu0 }
 0x3b1   : > { %v2188_v22 = vpop.f32.mrb[3].mxu0 }
 0x421   : > { %v3065_v25 = vpop.f32.mrb[4].mxu0 }
 0x422   : > { %v2199_v26 = vpop.f32.mrb[5].mxu0  ;;  %v1170_v27 = vsel %vm964_vm6, %v3065_v25, -inf }
 0x423   : > { %1171 = vmax.xlane.f32.xlu1 %v1170_v27  ;;  %v1165_v28 = vpop.f32.mrb[6].mxu0 }
 0x424   : > { %v2200_v29 = vpop.f32.mrb[7].mxu0 }
 0x429   : > { %v3069_v30 = vpop.f32.mrb[8].mxu0 }
 0x42a   : > { %v2211_v31 = vpop.f32.mrb[9].mxu0  ;;  %v1313_v32 = vsel %vm964_vm6, %v3069_v30, -inf }
 0x42b   : > { %1314 = vmax.xlane.f32.xlu0 %v1313_v32  ;;  %v1308_v33 = vpop.f32.mrb[10].mxu0 }
 0x42c   : > { %v2212_v34 = vpop.f32.mrb[11].mxu0 }
 0x431   : > { %v3073_v35 = vpop.f32.mrb[12].mxu0 }
 0x432   : > { %v2223_v36 = vpop.f32.mrb[13].mxu0  ;;  %v1456_v37 = vsel %vm964_vm6, %v3073_v35, -inf }
 0x433   : > { %1457 = vmax.xlane.f32.xlu0 %v1456_v37  ;;  %v1451_v38 = vpop.f32.mrb[14].mxu0 }
 0x434   : > { %v2224_v39 = vpop.f32.mrb[15].mxu0 }
 0x43d   : > { %v1029_v41 = vpop.xlane.xlu0 %1028 }
 0x43e   : > { %v1030_v42 = vmax.f32 %v1026_v40, %v1029_v41 }
 0x440   : > { %v3077_v43 = vsub.f32 %v1026_v40, %v1030_v42  ;;  %1112 = vst.msk [vmem:[#allocation5] sm:$0xff] %vm955_vm8, %v1030_v42 }
 0x449   : > { %1039 = vperm.xlu0 %2381, %v1030_v42  }
 0x4b0   : > { %v1172_v45 = vpop.xlane.xlu1 %1171 }
 0x4b1   : > { %v1173_v46 = vmax.f32 %v1169_v44, %v1172_v45 }
 0x4b3   : > { %v1174_v47 = vsub.f32 %v1169_v44, %v1173_v46  ;;  %1255 = vst.msk [vmem:[#allocation5 + $0x8] sm:$0xff] %vm955_vm8, %v1173_v46  ;;  %1182 = vperm.xlu1 %2382, %v1173_v46  }
 0x4b5   : > { %v1175_v49 = vpack.c.bf16 %v1174_v47, %v1174_v47 }
 0x4b7   : > { %779 = vrot.lane.b32.xlu1 %v3015_v52, %s2682_s20  ;;  %v1177_v53 = vmul.bf16 1069105081, %v1175_v49  ;;  %s3305_s20 = sld [smem:[#allocation33_spill]] }
 0x4b8   : > { %v1315_v50 = vpop.xlane.xlu0 %1314 }
 0x4b9   : > { %v1316_v51 = vmax.f32 %v1312_v48, %v1315_v50  ;;  %2408 = vpow.bf16 %v1177_v53 }
 0x4bb   : > { %v1317_v54 = vsub.f32 %v1312_v48, %v1316_v51  ;;  %1398 = vst.msk [vmem:[#allocation5 + $0x10] sm:$0xff] %vm955_vm8, %v1316_v51  ;;  %1325 = vperm.xlu1 %2382, %v1316_v51   ;;  %v1032_v48 = vpack.c.bf16 %v3077_v43, %v3077_v43  ;;  %v1191_v51 = vld [vmem:[#allocation6 + $0x8] sm:$0xff] }
 0x4bd   : > { %v1318_v55 = vpack.c.bf16 %v1317_v54, %v1317_v54  ;;  %v1034_v49 = vmul.bf16 1069105081, %v1032_v48 }
 0x4bf   : > { %v1320_v57 = vmul.bf16 1069105081, %v1318_v55  ;;  %792 = vrot.lane.b32.xlu1 %v3015_v52, %s2683_s28  ;;  %s3310_s28 = sld [smem:[#allocation36_spill]] }
 0x4c0   : > { %v1458_v58 = vpop.xlane.xlu0 %1457 }
 0x4c1   : > { %2410 = vpow.bf16 %v1320_v57  ;;  %v1459_v59 = vmax.f32 %v1455_v56, %v1458_v58 }
 0x4c3   : > { %v1460_v60 = vsub.f32 %v1455_v56, %v1459_v59  ;;  %1541 = vst.msk [vmem:[#allocation5 + $0x18] sm:$0xff] %vm955_vm8, %v1459_v59  ;;  %1468 = vperm.xlu1 %2382, %v1459_v59   ;;  %v1047_v56 = vld [vmem:[#allocation6] sm:$0xff] }
 0x4c4   : > { %v3086_v61 = vpop.eup %2408 }
 0x4c5   : > { %v1179_v63 = vunpack.c.l.bf16 %v3086_v61  ;;  %v1461_v23 = vpack.c.bf16 %v1460_v60, %v1460_v60  ;;  %v1334_v60 = vld [vmem:[#allocation6 + $0x10] sm:$0xff]  ;;  %v1477_v61 = vld [vmem:[#allocation6 + $0x18] sm:$0xff] }
 0x4c7   : > { %805 = vrot.lane.b32.xlu1 %v3015_v52, %s2684_s13  ;;  %v1463_v32 = vmul.bf16 1069105081, %v1461_v23  ;;  %v1192_v53 = vmul.f32 %v1191_v51, %v1179_v63  ;;  %s3200_s13 = scalar_lea.hbm %s3310_s28, %s2129_s19 }
 0x4c8   : > { %v1040_v3 = vpop.permute.xlu0 %1039 }
 0x4c9   : > { %v1042_v4 = vsub.f32 %v3049_v18, %v1040_v3 }
 0x4cb   : > { %818 = vrot.lane.b32.xlu1 %v3015_v52, %s2685_s25  ;;  %v1043_v5 = vpack.c.bf16 %v1042_v4, %v1042_v4  ;;  %s3306_s25 = sld [smem:[#allocation23_spill]] }
 0x4cc   : > { %v3089_v62 = vpop.eup %2410 }
 0x4cd   : > { %v1322_v0 = vunpack.c.l.bf16 %v3089_v62  ;;  %v1045_v7 = vmul.bf16 1069105081, %v1043_v5 }
 0x4cf   : > { %v3097_v2 = vpack.i.bf16 %v1322_v0, %v1179_v63  ;;  %2412 = vpow.bf16 %v1045_v7  ;;  %v1335_v43 = vmul.f32 %v1334_v60, %v1322_v0 }
 0x4d1   : > { %s637_s15 = sand.u32 1, %s3306_s25  }
 0x4d2   : > { %s2075_s22 = sshll.u32 %s637_s15, 3  ;;  %s1863_s24 = scalar_lea.sflag [#allocation10], %s637_s15 }
 0x4d3   : > { %s639_s17 = scalar_lea.vmem [#allocation17], %s2075_s22 }
 0x4d4   : > { %s1877_s0 = sshll.u32 %s639_s17, 4  ;;  %s3202_s0 = int_to_ptr.vmem [resolvable:$true] %s1877_s0 }
 0x4d5   : > { %s2576_s25 = scalar_lea.vmem %s3202_s0, 128 }
 0x4d6   : > { %p2577_p1 = scmp.ne.s32.totalorder %s3202_s0, %s2576_s25 }
 0x4d8   : > { %p2578_p10 = pnand %p2577_p1, %p3311_p8 }
 0x4da   : > { %v2413_v19 = vpop.eup %2412  ;;  %p2579_p11 = pneg %p2578_p10 }
 0x4db   : > { %v1049_v31 = vunpack.c.l.bf16 %v2413_v19 }
 0x4dd   : > { %v1050_v34 = vsel %vm964_vm6, %v1049_v31, 0.0 }
 0x532   : > { %v1183_v6 = vpop.permute.xlu1 %1182 }
 0x533   : > { %v1185_v52 = vsub.f32 %v3065_v25, %v1183_v6 }
 0x535   : > { %v1186_v8 = vpack.c.bf16 %v1185_v52, %v1185_v52 }
 0x536   : > { %v780_v9 = vpop.permute.xlu1 %779 }
 0x537   : > { %v1188_v10 = vmul.bf16 1069105081, %v1186_v8  ;;  %784 = vst.msk [vmem:[#allocation4] sm:$0xf] %vm774_vm7, %v780_v9 }
 0x539   : > { %2414 = vpow.bf16 %v1188_v10 }
 0x53a   : > { %v1326_v11 = vpop.permute.xlu1 %1325 }
 0x53b   : > { %v1328_v12 = vsub.f32 %v3069_v30, %v1326_v11 }
 0x53d   : > { %v1329_v13 = vpack.c.bf16 %v1328_v12, %v1328_v12 }
 0x53e   : > { %v793_v14 = vpop.permute.xlu1 %792  ;;  %v978_v16 = vld [vmem:[#allocation4] sm:$0xf] }
 0x53f   : > { %v1331_v17 = vmul.bf16 1069105081, %v1329_v13  ;;  %2086 = vst.msk [vmem:[#allocation4 + $0x4] sm:$0xf] %vm774_vm7, %v793_v14  ;;  %v1068_v18 = vsel %vm1066_vm9, %v978_v16, 0 }
 0x540   : > { %2190 = vmatpush3.bf16.msra.mxu1 %v1068_v18 }
 0x541   : > { %2416 = vpow.bf16 %v1331_v17  ;;  %2201 = vmatprep.subr.bf16.mxu1 %v2675_v15 }
 0x542   : > { %v1469_v20 = vpop.permute.xlu1 %1468 }
 0x543   : > { %v1471_v21 = vsub.f32 %v3073_v35, %v1469_v20  ;;  %2192 = vmatmul.mubr.msk.bf16.vlgmr.msra.gmra.mrb[8].mxu1 %vm964_vm6, %v2413_v19  ;;  %v1200_v19 = vld [vmem:[#allocation7 + $0x8] sm:$0xff] }
 0x544   : > { %v2415_v22 = vpop.eup %2414  ;;  %2203 = vmatprep.mubr.msk.bf16.mxu1 %vm2676_vm1, %v2675_v15 }
 0x545   : > { %v1472_v24 = vpack.c.bf16 %v1471_v21, %v1471_v21  ;;  %v1193_v25 = vunpack.c.l.bf16 %v2415_v22 }
 0x546   : > { %v806_v26 = vpop.permute.xlu1 %805  ;;  %v2101_v27 = vld [vmem:[#allocation4 + $0x4] sm:$0xf] }
 0x547   : > { %v1474_v28 = vmul.bf16 1069105081, %v1472_v24  ;;  %2088 = vst.msk [vmem:[#allocation4 + $0x8] sm:$0xf] %vm774_vm7, %v806_v26  ;;  %v1194_v29 = vsel %vm964_vm6, %v1193_v25, 0.0  ;;  %v1211_v30 = vsel %vm1066_vm9, %v2101_v27, 0 }
 0x548   : > { %1195 = vadd.xlane.f32.xlu1 %v1194_v29  ;;  %2202 = vmatpush3.bf16.msra.mxu1 %v1211_v30  ;;  %v1343_v27 = vld [vmem:[#allocation7 + $0x10] sm:$0xff] }
 0x549   : > { %2418 = vpow.bf16 %v1474_v28  ;;  %2213 = vmatprep.subr.bf16.mxu1 %v2675_v15 }
 0x54a   : > { %v819_v33 = vpop.permute.xlu1 %818  ;;  %2420 = vpow.bf16 %v1463_v32 }
 0x54b   : > { %2090 = vst.msk [vmem:[#allocation4 + $0xc] sm:$0xf] %vm774_vm7, %v819_v33  ;;  %2204 = vmatmul.mubr.msk.bf16.vlgmr.msra.gmra.mrb[12].mxu1 %vm964_vm6, %v2415_v22  ;;  %2422 = vpow.bf16 %v1034_v49 }
 0x54c   : > { %v2417_v35 = vpop.eup %2416  ;;  %1051 = vadd.xlane.f32.xlu1 %v1050_v34  ;;  %2215 = vmatprep.mubr.msk.bf16.mxu1 %vm2676_vm1, %v2675_v15  ;;  %v1486_v34 = vld [vmem:[#allocation7 + $0x18] sm:$0xff] }
 0x54d   : > { %v1336_v36 = vunpack.c.l.bf16 %v2417_v35 }
 0x54e   : > { %v2105_v37 = vld [vmem:[#allocation4 + $0x8] sm:$0xf] }
 0x54f   : > { %v1337_v38 = vsel %vm964_vm6, %v1336_v36, 0.0  ;;  %v1354_v39 = vsel %vm1066_vm9, %v2105_v37, 0 }
 0x550   : > { %1338 = vadd.xlane.f32.xlu0 %v1337_v38  ;;  %2214 = vmatpush3.bf16.msra.mxu1 %v1354_v39 }
 0x551   : > { %2225 = vmatprep.subr.bf16.mxu1 %v2675_v15 }
 0x552   : > { %v2109_v40 = vld [vmem:[#allocation4 + $0xc] sm:$0xf] }
 0x553   : > { %2216 = vmatmul.mubr.msk.bf16.vlgmr.msra.gmra.mrb[16].mxu1 %vm964_vm6, %v2417_v35  ;;  %v1497_v41 = vsel %vm1066_vm9, %v2109_v40, 0 }
 0x554   : > { %v2419_v42 = vpop.eup %2418  ;;  %2226 = vmatpush3.bf16.msra.mxu1 %v1497_v41  ;;  %2227 = vmatprep.mubr.msk.bf16.mxu1 %vm2676_vm1, %v2675_v15 }
 0x555   : > { %v1479_v44 = vunpack.c.l.bf16 %v2419_v42  ;;  %2239 = vmatprep.subr.bf16.mxu1 %v2675_v15  ;;  %v2421_v46 = vpop.eup %2420 }
 0x556   : > { %v1465_v47 = vunpack.c.l.bf16 %v2421_v46  ;;  %v2423_v50 = vpop.eup %2422 }
 0x557   : > { %v1480_v45 = vsel %vm964_vm6, %v1479_v44, 0.0  ;;  %v1036_v54 = vunpack.c.l.bf16 %v2423_v50 }
 0x558   : > { %1481 = vadd.xlane.f32.xlu0 %v1480_v45  ;;  %v1478_v63 = vmul.f32 %v1477_v61, %v1465_v47  ;;  %v2392_v45 = vld [vmem:[#allocation14] sm:$0xff]  }
 0x559   : > { %v1048_v58 = vmul.f32 %v1047_v56, %v1036_v54  ;;  %2232 = vmatpush3.bf16.msra.mxu0 %v2392_v45 }
 0x55a   : > { %2233 = vmatprep.subr.bf16.mxu0 %v2675_v15 }
 0x55b   : > { %2228 = vmatmul.mubr.msk.bf16.vlgmr.msra.gmra.mrb[20].mxu1 %vm964_vm6, %v2419_v42 }
 0x55c   : > { %2243 = vmatprep.mubr.msk.bf16.mxu1 %vm2676_vm1, %v2675_v15 }
 0x55d   : > { %1489 = vperm.xlu1 %2382, %v1465_v47   ;;  %v2393_v47 = vld [vmem:[#allocation14 + $0x8] sm:$0xff]  }
 0x55e   : > { %2234 = vmatpush3.bf16.msra.mxu0 %v2393_v47 }
 0x55f   : > { %2247 = vmatprep.subr.bf16.mxu0 %v2675_v15 }
 0x56e   : > { %2384 = vperm.xlu0 %2381, %v3097_v2  }
 0x5d5   : > { %v1196_v55 = vpop.xlane.xlu1 %1195 }
 0x5d6   : > { %v1197_v57 = vadd.f32 %v1196_v55, %v1192_v53  ;;  %v1056_v53 = vld [vmem:[#allocation7] sm:$0xff] }
 0x5d8   : > { %1198 = vst.msk [vmem:[#allocation6 + $0x8] sm:$0xff] %vm955_vm8, %v1197_v57 }
 0x5d9   : > { %v1052_v59 = vpop.xlane.xlu1 %1051 }
 0x5da   : > { %v1053_v2 = vadd.f32 %v1052_v59, %v1048_v58 }
 0x5dc   : > { %1055 = vst.msk [vmem:[#allocation6] sm:$0xff] %vm955_vm8, %v1053_v2 }
 0x5dd   : > { %v1339_v3 = vpop.xlane.xlu0 %1338  ;;  %v1490_v35 = vpop.permute.xlu1 %1489 }
 0x5de   : > { %v1340_v4 = vadd.f32 %v1339_v3, %v1335_v43  ;;  %v1492_v36 = vmul.f32 %v1490_v35, %v1486_v34  ;;  %v2117_v35 = vld [vmem:[%s3305_s20] ss:$0 sm:$0xff] }
 0x5df   : > { %v1557_v5 = vld [vmem:[#allocation6 + $0x8] sm:$0xff] }
 0x5e0   : > { %1341 = vst.msk [vmem:[#allocation6 + $0x10] sm:$0xff] %vm955_vm8, %v1340_v4  ;;  %2424 = vrcp.f32 %v1557_v5 }
 0x5e3   : > { %v1547_v62 = vld [vmem:[#allocation6] sm:$0xff] }
 0x5e5   : > { %v1482_v6 = vpop.xlane.xlu0 %1481 }
 0x5e6   : > { %v1483_v7 = vadd.f32 %v1482_v6, %v1478_v63 }
 0x5e7   : > { %v1567_v52 = vld [vmem:[#allocation6 + $0x10] sm:$0xff] }
 0x5e8   : > { %1484 = vst.msk [vmem:[#allocation6 + $0x18] sm:$0xff] %vm955_vm8, %v1483_v7  ;;  %2426 = vrcp.f32 %v1567_v52 }
 0x5ea   : > { %v2425_v8 = vpop.eup %2424 }
 0x5eb   : > { %1561 = vperm.xlu1 %2382, %v2425_v8  }
 0x5ed   : > { %v2385_v12 = vpop.permute.xlu0 %2384 }
 0x5ee   : > { %v2386_v17 = vunpack.i.l.bf16 %v2385_v12  ;;  %v2387_v25 = vunpack.i.h.bf16 %v2385_v12 }
 0x5ef   : > { %v1577_v9 = vld [vmem:[#allocation6 + $0x18] sm:$0xff] }
 0x5f0   : > { %2428 = vrcp.f32 %v1577_v9  ;;  %v1206_v20 = vmul.f32 %v2386_v17, %v1200_v19  ;;  %v1349_v28 = vmul.f32 %v2387_v25, %v1343_v27 }
 0x5f1   : > { %2430 = vrcp.f32 %v1547_v62  ;;  %v2115_v62 = vld [vmem:[#allocation16] ss:$0 sm:$0xff] }
 0x5f2   : > { %v2427_v0 = vpop.eup %2426 }
 0x5f3   : > { %1571 = vperm.xlu0 %2381, %v2427_v0  }
 0x5f7   : > { %1059 = vperm.xlu0 %2381, %v1036_v54  }
 0x5fa   : > { %v2429_v10 = vpop.eup %2428 }
 0x5fb   : > { %1581 = vperm.xlu1 %2382, %v2429_v10   ;;  %v2431_v11 = vpop.eup %2430 }
 0x5ff   : > { %1551 = vperm.xlu1 %2382, %v2431_v11  }
 0x616   : > { %v1104_v13 = vpop.f32.mrb[8].mxu1 }
 0x617   : > { %v2193_v14 = vpop.f32.mrb[9].mxu1 }
 0x618   : > { %v1107_v16 = vpop.f32.mrb[10].mxu1 }
 0x619   : > { %v2194_v18 = vpop.f32.mrb[11].mxu1 }
 0x61e   : > { %v1247_v21 = vpop.f32.mrb[12].mxu1 }
 0x61f   : > { %v1253_v22 = vadd.f32 %v1247_v21, %v1206_v20  ;;  %v2205_v23 = vpop.f32.mrb[13].mxu1  ;;  %v2395_v21 = vld [vmem:[%s3260_s12 + $0x8] sm:$0xff]  }
 0x620   : > { %v1250_v24 = vpop.f32.mrb[14].mxu1  ;;  %v2397_v23 = vld [vmem:[%s3262_s14 + $0x8] sm:$0xff]  }
 0x621   : > { %1254 = vst.msk [vmem:[#allocation7 + $0x8] sm:$0xff] %vm964_vm6, %v1253_v22  ;;  %v2206_v26 = vpop.f32.mrb[15].mxu1  ;;  %v2396_v22 = vld [vmem:[%s3262_s14] sm:$0xff]  }
 0x626   : > { %v1390_v29 = vpop.f32.mrb[16].mxu1 }
 0x627   : > { %v1396_v30 = vadd.f32 %v1390_v29, %v1349_v28  ;;  %v2217_v31 = vpop.f32.mrb[17].mxu1 }
 0x628   : > { %v1393_v32 = vpop.f32.mrb[18].mxu1  ;;  %v1556_v44 = vld [vmem:[#allocation7 + $0x8] sm:$0xff] }
 0x629   : > { %1397 = vst.msk [vmem:[#allocation7 + $0x10] sm:$0xff] %vm964_vm6, %v1396_v30  ;;  %v2218_v33 = vpop.f32.mrb[19].mxu1  ;;  %v2116_v32 = vld [vmem:[%s3258_s10] ss:$0 sm:$0xff] }
 0x62e   : > { %v1533_v37 = vpop.f32.mrb[20].mxu1 }
 0x62f   : > { %v1539_v38 = vadd.f32 %v1533_v37, %v1492_v36  ;;  %v2229_v39 = vpop.f32.mrb[21].mxu1 }
 0x630   : > { %v1536_v40 = vpop.f32.mrb[22].mxu1  ;;  %v1566_v50 = vld [vmem:[#allocation7 + $0x10] sm:$0xff]  ;;  %v2398_v39 = vld [vmem:[%s3262_s14 + $0x10] sm:$0xff]  }
 0x631   : > { %1540 = vst.msk [vmem:[#allocation7 + $0x18] sm:$0xff] %vm964_vm6, %v1539_v38  ;;  %v2230_v41 = vpop.f32.mrb[23].mxu1  ;;  %v2399_v40 = vld [vmem:[%s3262_s14 + $0x18] sm:$0xff]  }
 0x632   : > { %v2118_v41 = vld [vmem:[%s3307_s21] ss:$0 sm:$0xff] }
 0x638   : > { %v1576_v58 = vld [vmem:[#allocation7 + $0x18] sm:$0xff] }
 0x66a   : > { %v1562_v42 = vpop.permute.xlu1 %1561 }
 0x66b   : > { %v1564_v46 = vmul.f32 %v1562_v42, %v1556_v44 }
 0x66d   : > { %v1565_v48 = vpack.c.bf16 %v1564_v46, %v1564_v46 }
 0x66f   : > { %1587 = vrot.lane.b32.xlu0 %v1565_v48, %s2686_s26  ;;  %s2689_s26 = smov [#allocation17]  }
 0x672   : > { %v1572_v49 = vpop.permute.xlu0 %1571 }
 0x673   : > { %v1574_v51 = vmul.f32 %v1572_v49, %v1566_v50 }
 0x675   : > { %v1575_v54 = vpack.c.bf16 %v1574_v51, %v1574_v51 }
 0x676   : > { %v1060_v55 = vpop.permute.xlu0 %1059 }
 0x677   : > { %v1062_v56 = vmul.f32 %v1060_v55, %v1056_v53  ;;  %1590 = vrot.lane.b32.xlu1 %v1575_v54, %s2687_s6  ;;  %s2580_s6 = sshll.u32 %s2689_s26, 4  ;;  %s2581_s6 = int_to_ptr.vmem [resolvable:$false] %s2580_s6 }
 0x678   : > { %p2583_p2 = scmp.lt.s32.totalorder %s3202_s0, %s2581_s6 }
 0x679   : > { %v1110_v57 = vadd.f32 %v1104_v13, %v1062_v56 }
 0x67a   : > { %v1582_v59 = vpop.permute.xlu1 %1581 }
 0x67b   : > { %1111 = vst.msk [vmem:[#allocation7] sm:$0xff] %vm964_vm6, %v1110_v57  ;;  %v1584_v60 = vmul.f32 %v1582_v59, %v1576_v58 }
 0x67d   : > { %v1585_v2 = vpack.c.bf16 %v1584_v60, %v1584_v60 }
 0x67e   : > { %v1552_v3 = vpop.permute.xlu1 %1551 }
 0x67f   : > { %1593 = vrot.lane.b32.xlu0 %v1585_v2, %s2688_s18  ;;  %s2582_s18 = scalar_lea.vmem %s2581_s6, 256 }
 0x680   : > { %p2584_p3 = scmp.lt.s32.totalorder %s2582_s18, %s2576_s25 }
 0x682   : > { %v1546_v43 = vld [vmem:[#allocation7] sm:$0xff]  ;;  %p2585_p5 = por %p2584_p3, %p2583_p2 }
 0x683   : > { %v1554_v4 = vmul.f32 %v1552_v3, %v1546_v43 }
 0x684   : > { %p2586_p6 = pnand %p2585_p5, %p2579_p11 }
 0x685   : > { %v1555_v61 = vpack.c.bf16 %v1554_v4, %v1554_v4 }
 0x6e1   : > { %v1588_v5 = vpop.permute.xlu0 %1587 }
 0x6e2   : > { %v1597_v6 = vsel %vm964_vm6, %v1555_v61, %v1588_v5 }
 0x6e9   : > { %v1591_v63 = vpop.permute.xlu1 %1590 }
 0x6ea   : > { %v1600_v7 = vsel %vm1598_vm10, %v1597_v6, %v1591_v63 }
 0x6f1   : > { %v1594_v52 = vpop.permute.xlu0 %1593 }
 0x6f2   : > { %v1603_v8 = vsel %vm1601_vm11, %v1600_v7, %v1594_v52 }
 0x6f3   : > { %2236 = vmatmul.mubr.msk.bf16.vlgmr.msra.gmra.mrb[16].mxu0 %vm666_vm0, %v1603_v8 }
 0x6f4   : > { %2255 = vmatprep.mubr.msk.bf16.mxu0 %vm2676_vm1, %v2675_v15  ;;  %2248 = vmatpush3.bf16.msra.mxu0 %v2396_v22 }
 0x6f5   : > { %2249 = vmatprep.subr.bf16.mxu0 %v2675_v15 }
 0x6f8   : > { %2250 = vmatpush3.bf16.msra.mxu0 %v2397_v23 }
 0x6f9   : > { %2251 = vmatprep.subr.bf16.mxu0 %v2675_v15 }
 0x6fc   : > { %2252 = vmatpush3.bf16.msra.mxu0 %v2398_v39 }
 0x6fd   : > { %2253 = vmatprep.subr.bf16.mxu0 %v2675_v15 }
 0x700   : > { %2254 = vmatpush3.bf16.msra.mxu0 %v2399_v40 }
 0x7c6   : > { %v1657_v9 = vpop.f32.mrb[16].mxu0 }
 0x7c7   : > { %v1663_v0 = vadd.f32 %v1657_v9, %v2971_v1  ;;  %v2237_v10 = vpop.f32.mrb[17].mxu0  ;;  %v2394_v1 = vld [vmem:[%s3260_s12] sm:$0xff]  }
 0x7c8   : > { %v1660_v11 = vpop.f32.mrb[18].mxu0  ;;  %2240 = vmatpush3.bf16.msra.mxu1 %v2394_v1 }
 0x7c9   : > { %v3153_v12 = vadd.f32 %v2115_v62, %v1663_v0  ;;  %v2238_v13 = vpop.f32.mrb[19].mxu0  ;;  %2241 = vmatprep.subr.bf16.mxu1 %v2675_v15  ;;  %v2122_v15 = vld [vmem:[%s3308_s30] ss:$0 sm:$0xff] }
 0x7cb   : > { %v1674_v14 = vsel %vm666_vm0, %v3153_v12, 0.0 }
 0x7cc   : > { %1675 = vadd.xlane.f32.xlu1 %v1674_v14  ;;  %2242 = vmatpush3.bf16.msra.mxu1 %v2395_v21 }
 0x859   : > { %v1676_v16 = vpop.xlane.xlu1 %1675 }
 0x85a   : > { %v1677_v17 = vmul.f32 0.03125, %v1676_v16 }
 0x85c   : > { %v1678_v18 = vsub.f32 %v3153_v12, %v1677_v17 }
 0x85e   : > { %v1679_v19 = vmul.f32 %v1678_v18, %v1678_v18  ;;  %v1699_v33 = vmul.f32 %v2116_v32, %v1678_v18 }
 0x860   : > { %v1680_v20 = vsel %vm666_vm0, %v1679_v19, 0.0 }
 0x861   : > { %1681 = vadd.xlane.f32.xlu0 %v1680_v20 }
 0x8ee   : > { %v1682_v24 = vpop.xlane.xlu0 %1681 }
 0x8ef   : > { %v1683_v25 = vmul.f32 0.032258064, %v1682_v24 }
 0x8f1   : > { %2432 = vrsqrt.f32 %v1683_v25  ;;  %vm1686_vm12 = vcmp.eq.f32.partialorder %v1683_v25, inf  ;;  %v1689_v28 = vand.u32 2147483648, %v1683_v25  ;;  %vm1688_vm13 = vcmp.eq.f32.partialorder %v1683_v25, 0.0 }
 0x8fb   : > { %v2433_v26 = vpop.eup %2432 }
 0x8fc   : > { %v1685_v27 = vmul.f32 %v2433_v26, %v1683_v25 }
 0x8fe   : > { %v1687_v29 = vsel %vm1686_vm12, %v1683_v25, %v1685_v27 }
 0x8ff   : > { %v1690_v30 = vsel %vm1688_vm13, %v1689_v28, %v1687_v29 }
 0x900   : > { %v1691_v31 = vadd.f32 1e-06, %v1690_v30 }
 0x902   : > { %2434 = vrcp.f32 %v1691_v31 }
 0x90c   : > { %v2435_v34 = vpop.eup %2434 }
 0x90d   : > { %v1700_v36 = vmul.f32 %v2435_v34, %v1699_v33 }
 0x90f   : > { %v1707_v37 = vadd.f32 %v2117_v35, %v1700_v36 }
 0x911   : > { %v1708_v38 = vpack.c.bf16 %v1707_v37, %v1707_v37 }
 0x913   : > { %2244 = vmatmul.mubr.msk.bf16.vlgmr.msra.gmra.mrb[24].mxu1 %vm666_vm0, %v1708_v38 }
 0x9e6   : > { %v1769_v42 = vpop.f32.mrb[24].mxu1 }
 0x9e7   : > { %v1770_v44 = vadd.f32 %v2118_v41, %v1769_v42  ;;  %v2245_v45 = vpop.f32.mrb[25].mxu1 }
 0x9e8   : > { %v1772_v46 = vpop.f32.mrb[26].mxu1 }
 0x9e9   : > { %v1775_v47 = vmax.f32 %v1770_v44, 0.0  ;;  %v2246_v48 = vpop.f32.mrb[27].mxu1 }
 0x9eb   : > { %v1776_v49 = vpack.c.bf16 %v1775_v47, %v1775_v47 }
 0x9ed   : > { %2256 = vmatmul.mubr.msk.bf16.vlgmr.msra.gmra.mrb[20].mxu0 %vm1816_vm14, %v1776_v49 }
 0xac0   : > { %v1854_v50 = vpop.f32.mrb[20].mxu0 }
 0xac1   : > { %v1855_v51 = vadd.f32 %v2122_v15, %v1854_v50  ;;  %v2257_v53 = vpop.f32.mrb[21].mxu0 }
 0xac2   : > { %v1857_v54 = vpop.f32.mrb[22].mxu0 }
 0xac3   : > { %v1860_v55 = vadd.f32 %v1855_v51, %v3153_v12  ;;  %v2258_v56 = vpop.f32.mrb[23].mxu0 }
 0xac5   : > { %1861 = vst.msk [vmem:[%s639_s17] sm:$0xff] %vm666_vm0, %v1860_v55 }
 0xac6   : > { %2589 = shalt.err (!%p2586_p6)
}
 0xac7   : > { %s2590_s11 = scalar_lea.hbm %s3200_s13, 128  ;;  %s2594_s22 = scalar_lea.hbm %s3310_s28, 256 }
 0xac8   : > { %p2591_p7 = scmp.ne.s32.totalorder %s3200_s13, %s2590_s11  ;;  %p2595_p0 = scmp.lt.u32.totalorder %s3200_s13, %s3310_s28 }
 0xac9   : > { %p2596_p4 = scmp.lt.u32.totalorder %s2594_s22, %s2590_s11  ;;  %p2598_p1 = scmp.lt.u32.totalorder %s2590_s11, %s3200_s13 }
 0xaca   : > { %p2592_p9 = pnand %p2591_p7, %p3311_p8 }
 0xacb   : > { %p2597_p13 = por %p2596_p4, %p2595_p0 }
 0xacc   : > { %p2593_p12 = pneg %p2592_p9 }
 0xacd   : > { %p2599_p10 = por %p2598_p1, %p2597_p13 }
 0xacf   : > { %p2600_p11 = pnand %p2599_p10, %p2593_p12 }
 0xad1   : > { %2603 = shalt.err (!%p2600_p11)
}
 0xad2   : > { %2279 = dma.vmem_to_hbm [thread:$0]  (%p3311_p8), %s3202_s0, 128, %s3200_s13, %s1863_s24  }
 0xad3 PF: > { %s3312_s30 = sld [smem:[#allocation26_spill]]  ;;  %s3313_s19 = sld [smem:[#allocation22_spill]] }
 0xad4   : > { %s3314_s17 = sld [smem:[#allocation29_spill]] }
 0xad9   : > { %p2311_p2 = scmp.ge.s32.totalorder %s3312_s30, 2  ;;  %s1889_s29 = sand.u32 1, %s3313_s19  }
 0xada   : > { %p3315_p3 = scmp.ne.s32.totalorder %s3314_s17, 0  ;;  %s1890_s20 = scalar_lea.sflag [#allocation10], %s1889_s29 }
 0xadc   : > { %p2298_p5 = pnand %p2311_p2, %p3315_p3 }
 0xade   : > { %2641 = dma.done.wait (!%p2298_p5), %s1890_s20, 128  }
 0xadf   : > { %2643 = vsyncadd (!%p2298_p5), %s1890_s20, 4294967168  ;;  %s32_s26 = sadd.s32 1, %s3312_s30   ;;  %s3316_s21 = sld [smem:[#allocation23_spill]] }
 0xae0   : > { %p29_p6 = scmp.ge.s32.totalorder %s32_s26, 4   ;;  %s3317_s22 = sld [smem:[#allocation24_spill]] }
 0xae1   : > { %s3318_s23 = sld [smem:[#allocation30_spill]]  ;;  %s3319_s24 = sld [smem:[#allocation25_spill]] }
 0xae2   : > { %s3320_s25 = sld [smem:[#allocation27_spill]]  ;;  %31 = sbr.rel (!%p29_p6) target bundleno = 14 (0xe), region = 186 }
 0xae9   :  { %1895 = vsyncpa [#allocation9], 1 }
 0xaea   :  { %1897 = vsyncpa [#allocation9 + $0x1], 1 }
 0xaeb   :  { %1898 = vsyncpa [#allocation12], 1 }
 0xaec   :  { %1899 = vsyncpa [#allocation15], 1 }
 0xaed   :  { %1900 = vsyncpa [#allocation10], 1 }
 0xaee   :  { %1902 = vsyncpa [#allocation10 + $0x1], 1 }

</bundles_post_ra>
